<compile_context>
chip_gen: v6e
topology: v6e:2x2x1
jax: 0.10.0
libtpu: 0.0.40
codegen_flags: <defaults>
</compile_context>

<pallas_src>
import functools
import math

import jax
import jax.numpy as jnp
from jax import lax
from jax.experimental import pallas as pl
from jax.experimental.pallas import tpu as pltpu


_SUBLANE = {1: 32, 2: 16}          # min sublane multiple per itemsize (default 8 for 4-byte)
_TARGET_TILE_BYTES = 4 << 20       # ~4 MiB x tiles: near HBM roofline, low grid-step overhead
_VMEM_FLOOR = 32 << 20             # raise v5e's 16 MiB scoped default
_VMEM_CAP = 48 << 20               # stay inside v7x's 64 MiB physical VMEM
_NBUF = 3                          # buffering depth requested for the streamed x input
_FUSED_GATE_BYTES = 4 << 20        # fused single-read path gate (f32, lane-padded)


def _round_up(x, m):
    return -(-x // m) * m


def _cparams(need_bytes, semantics):
    limit = int(min(_VMEM_CAP, max(_VMEM_FLOOR, need_bytes + (8 << 20))))
    return pltpu.CompilerParams(dimension_semantics=semantics,
                                vmem_limit_bytes=limit)


def _x_block_spec(shape, index_map, nbuf=_NBUF):
    """BlockSpec for the streamed x input; request deeper pipelining if supported."""
    if nbuf > 2 and hasattr(pl, "Buffered"):
        try:
            return pl.BlockSpec(shape, index_map, pipeline_mode=pl.Buffered(nbuf))
        except TypeError:
            pass
    return pl.BlockSpec(shape, index_map)


def _choose_row_tile(np_rows, cp, itemsize, target_bytes=_TARGET_TILE_BYTES):
    """Dtype-aware row tile: ~target_bytes per tile, sublane-aligned, >=2 tiles
    whenever possible (v7x 2-TC sharding); ragged tails handled by the kernels."""
    sub = _SUBLANE.get(itemsize, 8)
    rows = max(sub, (target_bytes // max(1, cp * itemsize)) // sub * sub)
    if rows < np_rows:
        return rows
    if np_rows >= 2 * sub:
        half = _round_up(_round_up(np_rows, 2) // 2, sub)
        if half < np_rows:
            return half
    return np_rows          # full-extent single block (always legal)


# --------------------------------------------------------------------------
# Kernels
# --------------------------------------------------------------------------
def _stats_kernel(x_ref, part_ref, *, rows_total, tile_rows, ragged):
    # x_ref:    (TN, Cp)     one row tile of packed points
    # part_ref: (1, 2, Cp)   [column sum, column sum-of-squares] for this tile
    x = x_ref[...].astype(jnp.float32)
    if ragged:
        rem = rows_total - pl.program_id(0) * tile_rows
        rid = lax.broadcasted_iota(jnp.int32, x.shape, 0)
        x = jnp.where(rid < rem, x, 0.0)          # zero out padded rows (safe vs NaN garbage)
    part_ref[0, 0:1, :] = jnp.sum(x, axis=0, keepdims=True)
    part_ref[0, 1:2, :] = jnp.sum(x * x, axis=0, keepdims=True)


def _apply_kernel(x_ref, scale_ref, shift_ref, o_ref):
    # x_ref: (TN, Cp); scale/shift: (1, Cp) per-packed-column affine.
    x = x_ref[...].astype(jnp.float32)
    o_ref[...] = (x * scale_ref[...] + shift_ref[...]).astype(o_ref.dtype)


def _fused_kernel(x_ref, gamma_ref, beta_ref, o_ref, *, count, eps):
    # Single-read path: x_ref (N, G, Cg) fully VMEM-resident.
    x = x_ref[...].astype(jnp.float32)                 # (N, G, Cg)
    t = jnp.sum(x, axis=0)                             # (G, Cg)
    t2 = jnp.sum(x * x, axis=0)                        # (G, Cg)
    s = jnp.sum(t, axis=-1, keepdims=True)             # (G, 1)
    ss = jnp.sum(t2, axis=-1, keepdims=True)           # (G, 1)
    mean = s * (1.0 / count)
    # TODO(synk): E[x^2]-mean^2 can cancel for |mean| >> std; a centered pass costs extra work.
    var = jnp.maximum(ss * (1.0 / count) - mean * mean, 0.0)
    inv = lax.rsqrt(var + eps)                         # (G, 1)
    scale = gamma_ref[...] * inv                       # (G, Cg)
    shift = beta_ref[...] - mean * scale               # (G, Cg)
    o_ref[...] = (x * scale + shift).astype(o_ref.dtype)


# --------------------------------------------------------------------------
# Wrapper
# --------------------------------------------------------------------------
def group_norm(x, gamma, beta, num_groups, eps=1e-5):
    """GroupNorm matching the PyTorch module's forward().

    x: (N, C) float array; gamma, beta: (C,)."""
    n_pts, n_ch = x.shape
    g = int(num_groups)
    cg = n_ch // g
    assert cg * g == n_ch, "num_channels must be divisible by num_groups"
    itemsize = jnp.dtype(x.dtype).itemsize
    count = float(n_pts) * float(cg)

    # ---------------- fused single-read path (small / medium inputs) -------
    rows_f = n_pts * g
    rows_pad = _round_up(rows_f, 32)
    lanes_pad = _round_up(cg, 128)
    f32_pad = rows_pad * lanes_pad * 4
    if f32_pad <= _FUSED_GATE_BYTES:
        in_pad = rows_pad * lanes_pad * itemsize
        need = 4 * in_pad + 3 * f32_pad + (1 << 20)
        x3 = x.reshape(n_pts, g, cg)                     # free contiguous reshape
        gamma2 = gamma.astype(jnp.float32).reshape(g, cg)
        beta2 = beta.astype(jnp.float32).reshape(g, cg)
        y3 = pl.pallas_call(
            functools.partial(_fused_kernel, count=count, eps=float(eps)),
            out_shape=jax.ShapeDtypeStruct((n_pts, g, cg), x.dtype),
            grid=(1,),
            in_specs=[
                pl.BlockSpec((n_pts, g, cg), lambda i: (0, 0, 0)),
                pl.BlockSpec((g, cg), lambda i: (0, 0)),
                pl.BlockSpec((g, cg), lambda i: (0, 0)),
            ],
            out_specs=pl.BlockSpec((n_pts, g, cg), lambda i: (0, 0, 0)),
            compiler_params=_cparams(need, ("arbitrary",)),
        )(x3, gamma2, beta2)
        return jnp.squeeze(y3.reshape(n_pts, n_ch))      # mimic torch .squeeze()

    # ---------------- streaming two-pass path -------------------------------
    # gcd-based lane packing: (N, C) -> (N/pack, pack*C) lane-dense rows (free reshape).
    pack = 128 // math.gcd(n_ch, 128)
    while pack > 1 and (n_pts % pack) != 0:
        pack //= 2
    np_rows = n_pts // pack
    cp = n_ch * pack
    xp = x.reshape(np_rows, cp)

    tn = _choose_row_tile(np_rows, cp, itemsize)
    n_tiles = -(-np_rows // tn)
    ragged = (np_rows % tn) != 0
    tile_bytes = tn * cp * itemsize

    # ---- pass 1: per-tile column sums / sums-of-squares --------------------
    partials = pl.pallas_call(
        functools.partial(_stats_kernel, rows_total=np_rows, tile_rows=tn,
                          ragged=ragged),
        out_shape=jax.ShapeDtypeStruct((n_tiles, 2, cp), jnp.float32),
        grid=(n_tiles,),
        in_specs=[_x_block_spec((tn, cp), lambda i: (i, 0))],
        out_specs=pl.BlockSpec((1, 2, cp), lambda i: (i, 0, 0)),
        compiler_params=_cparams(_NBUF * tile_bytes + (1 << 20), ("parallel",)),
    )(xp)

    # ---- fold stats into per-channel affine (tiny O(C) ops; fused under jit)
    col_sum = jnp.sum(partials[:, 0, :], axis=0)            # (Cp,)
    col_ssq = jnp.sum(partials[:, 1, :], axis=0)            # (Cp,)
    ch_sum = col_sum.reshape(pack, n_ch).sum(axis=0)         # (C,)
    ch_ssq = col_ssq.reshape(pack, n_ch).sum(axis=0)         # (C,)
    g_sum = ch_sum.reshape(g, cg).sum(axis=1)                # (G,)
    g_ssq = ch_ssq.reshape(g, cg).sum(axis=1)                # (G,)
    mean = g_sum / count
    var = jnp.maximum(g_ssq / count - mean * mean, 0.0)      # biased variance
    inv = lax.rsqrt(var + eps)                               # (G,)
    scale_c = gamma.astype(jnp.float32) * jnp.repeat(inv, cg)        # (C,)
    shift_c = beta.astype(jnp.float32) - jnp.repeat(mean, cg) * scale_c
    scale_p = jnp.tile(scale_c, pack).reshape(1, cp)
    shift_p = jnp.tile(shift_c, pack).reshape(1, cp)

    # ---- pass 2: y = x * scale + shift (lane-dense, parallel over tiles) ---
    yp = pl.pallas_call(
        _apply_kernel,
        out_shape=jax.ShapeDtypeStruct((np_rows, cp), x.dtype),
        grid=(n_tiles,),
        in_specs=[
            _x_block_spec((tn, cp), lambda i: (i, 0)),
            pl.BlockSpec((1, cp), lambda i: (0, 0)),     # VMEM-resident scale
            pl.BlockSpec((1, cp), lambda i: (0, 0)),     # VMEM-resident shift
        ],
        out_specs=pl.BlockSpec((tn, cp), lambda i: (i, 0)),
        compiler_params=_cparams(_NBUF * tile_bytes + 2 * tile_bytes + (1 << 20),
                                 ("parallel",)),
    )(xp, scale_p, shift_p)

    return jnp.squeeze(yp.reshape(n_pts, n_ch))              # mimic torch .squeeze()


# --------------------------------------------------------------------------
# Reference + test
# --------------------------------------------------------------------------
def _reference_group_norm(x, gamma, beta, num_groups, eps=1e-5):
    """Plain-JAX reference replicating torch.nn.GroupNorm on (1, C, N)."""
    n_pts, n_ch = x.shape
    g = num_groups
    cg = n_ch // g
    xg = jnp.transpose(x, (1, 0)).reshape(g, cg, n_pts)
    mean = jnp.mean(xg, axis=(1, 2), keepdims=True)
    var = jnp.mean((xg - mean) ** 2, axis=(1, 2), keepdims=True)
    xn = (xg - mean) / jnp.sqrt(var + eps)
    xn = xn * gamma.reshape(g, cg, 1) + beta.reshape(g, cg, 1)
    return jnp.squeeze(jnp.transpose(xn.reshape(n_ch, n_pts), (1, 0)))


if __name__ == "__main__":
    key = jax.random.PRNGKey(0)
    k1, k2, k3, k4 = jax.random.split(key, 4)

    gn = jax.jit(group_norm, static_argnames=("num_groups", "eps"))

    # Case 1: typical small KPConv point-feature block -> fused single-read path.
    num_points, num_channels, num_groups = 128, 64, 8
    x = jax.random.normal(k1, (num_points, num_channels), dtype=jnp.float32)
    gamma = 1.0 + 0.1 * jax.random.normal(k2, (num_channels,), dtype=jnp.float32)
    beta = 0.1 * jax.random.normal(k3, (num_channels,), dtype=jnp.float32)

    y = jax.block_until_ready(gn(x, gamma, beta, num_groups=num_groups))
    y_ref = _reference_group_norm(x, gamma, beta, num_groups)
    assert y.shape == (num_points, num_channels)
    assert jnp.allclose(y, y_ref, atol=2e-4, rtol=2e-4), (
        float(jnp.max(jnp.abs(y - y_ref))))

    # Case 2: larger ragged shape -> streaming two-pass path
    # (gcd lane packing pack=4 for C=96, cdiv grid, masked ragged last tile).
    n2, c2, g2 = 4100, 96, 6
    x2 = jax.random.normal(k4, (n2, c2), dtype=jnp.float32)
    gamma2 = jnp.ones((c2,), jnp.float32)
    beta2 = jnp.zeros((c2,), jnp.float32)

    y2 = jax.block_until_ready(gn(x2, gamma2, beta2, num_groups=g2))
    y2_ref = _reference_group_norm(x2, gamma2, beta2, g2)
    assert y2.shape == (n2, c2)
    assert jnp.allclose(y2, y2_ref, atol=2e-4, rtol=2e-4), (
        float(jnp.max(jnp.abs(y2 - y2_ref))))

    print("KERNEL_OK")
</pallas_src>

<mosaic_0001>
module attributes {stable_mosaic.version = 11 : i64} {
  func.func @_fused_kernel(%arg0: i32, %arg1: memref<128x8x8xf32, #tpu.memory_space<vmem>>, %arg2: memref<8x8xf32, #tpu.memory_space<vmem>>, %arg3: memref<8x8xf32, #tpu.memory_space<vmem>>, %arg4: memref<128x8x8xf32, #tpu.memory_space<vmem>>) attributes {dimension_semantics = [#tpu.dimension_semantics<arbitrary>], iteration_bounds = array<i64: 1>, scalar_prefetch = 0 : i64, scratch_operands = 0 : i64, tpu.core_type = #tpu.core_type<tc>, window_params = [{pipeline_mode = #tpu.pipeline_mode<synchronous>, transform_indices = @transform_0, window_bounds = array<i64: 128, 8, 8>}, {pipeline_mode = #tpu.pipeline_mode<synchronous>, transform_indices = @transform_1, window_bounds = array<i64: 8, 8>}, {pipeline_mode = #tpu.pipeline_mode<synchronous>, transform_indices = @transform_2, window_bounds = array<i64: 8, 8>}, {pipeline_mode = #tpu.pipeline_mode<synchronous>, transform_indices = @transform_3, window_bounds = array<i64: 128, 8, 8>}]} {
    %c0 = arith.constant 0 : index
    %c0_0 = arith.constant 0 : index
    %c0_1 = arith.constant 0 : index
    %0 = vector.load %arg1[%c0, %c0_0, %c0_1] : memref<128x8x8xf32, #tpu.memory_space<vmem>>, vector<128x8x8xf32>
    %cst = arith.constant dense<0.000000e+00> : vector<8x8xf32>
    %1 = vector.multi_reduction <add>, %0, %cst [0] : vector<128x8x8xf32> to vector<8x8xf32>
    %2 = arith.mulf %0, %0 : vector<128x8x8xf32>
    %cst_2 = arith.constant dense<0.000000e+00> : vector<8x8xf32>
    %3 = vector.multi_reduction <add>, %2, %cst_2 [0] : vector<128x8x8xf32> to vector<8x8xf32>
    %cst_3 = arith.constant dense<0.000000e+00> : vector<8xf32>
    %4 = vector.multi_reduction <add>, %1, %cst_3 [1] : vector<8x8xf32> to vector<8xf32>
    %5 = vector.shape_cast %4 : vector<8xf32> to vector<8x1xf32>
    %cst_4 = arith.constant dense<0.000000e+00> : vector<8xf32>
    %6 = vector.multi_reduction <add>, %3, %cst_4 [1] : vector<8x8xf32> to vector<8xf32>
    %7 = vector.shape_cast %6 : vector<8xf32> to vector<8x1xf32>
    %cst_5 = arith.constant 9.765625E-4 : f32
    %8 = vector.broadcast %cst_5 : f32 to vector<8x1xf32>
    %9 = arith.mulf %5, %8 : vector<8x1xf32>
    %cst_6 = arith.constant 9.765625E-4 : f32
    %10 = vector.broadcast %cst_6 : f32 to vector<8x1xf32>
    %11 = arith.mulf %7, %10 : vector<8x1xf32>
    %12 = arith.mulf %9, %9 : vector<8x1xf32>
    %13 = arith.subf %11, %12 : vector<8x1xf32>
    %cst_7 = arith.constant 0.000000e+00 : f32
    %14 = vector.broadcast %cst_7 : f32 to vector<8x1xf32>
    %15 = arith.maximumf %13, %14 : vector<8x1xf32>
    %cst_8 = arith.constant 9.99999974E-6 : f32
    %16 = vector.broadcast %cst_8 : f32 to vector<8x1xf32>
    %17 = arith.addf %15, %16 : vector<8x1xf32>
    %18 = math.rsqrt %17 : vector<8x1xf32>
    %c0_9 = arith.constant 0 : index
    %c0_10 = arith.constant 0 : index
    %19 = vector.load %arg2[%c0_9, %c0_10] : memref<8x8xf32, #tpu.memory_space<vmem>>, vector<8x8xf32>
    %20 = vector.broadcast %18 : vector<8x1xf32> to vector<8x8xf32>
    %21 = arith.mulf %19, %20 : vector<8x8xf32>
    %c0_11 = arith.constant 0 : index
    %c0_12 = arith.constant 0 : index
    %22 = vector.load %arg3[%c0_11, %c0_12] : memref<8x8xf32, #tpu.memory_space<vmem>>, vector<8x8xf32>
    %23 = vector.broadcast %9 : vector<8x1xf32> to vector<8x8xf32>
    %24 = arith.mulf %23, %21 : vector<8x8xf32>
    %25 = arith.subf %22, %24 : vector<8x8xf32>
    %26 = vector.shape_cast %21 : vector<8x8xf32> to vector<1x8x8xf32>
    %27 = vector.broadcast %26 : vector<1x8x8xf32> to vector<128x8x8xf32>
    %28 = arith.mulf %0, %27 : vector<128x8x8xf32>
    %29 = vector.shape_cast %25 : vector<8x8xf32> to vector<1x8x8xf32>
    %30 = vector.broadcast %29 : vector<1x8x8xf32> to vector<128x8x8xf32>
    %31 = arith.addf %28, %30 : vector<128x8x8xf32>
    %c0_13 = arith.constant 0 : index
    %c0_14 = arith.constant 0 : index
    %c0_15 = arith.constant 0 : index
    %32 = vector.load %arg4[%c0_13, %c0_14, %c0_15] : memref<128x8x8xf32, #tpu.memory_space<vmem>>, vector<128x8x8xf32>
    tpu.vector_store %arg4[%c0_13, %c0_14, %c0_15], %31 {strides = array<i32>} : memref<128x8x8xf32, #tpu.memory_space<vmem>>, vector<128x8x8xf32>,
    return
  }
  func.func @transform_0(%arg0: i32) -> (i32, i32, i32) {
    %c0_i32 = arith.constant 0 : i32
    %c0_i32_0 = arith.constant 0 : i32
    %c0_i32_1 = arith.constant 0 : i32
    %c0_i32_2 = arith.constant 0 : i32
    return %c0_i32, %c0_i32_0, %c0_i32_1 : i32, i32, i32
  }
  func.func @transform_1(%arg0: i32) -> (i32, i32) {
    %c0_i32 = arith.constant 0 : i32
    %c0_i32_0 = arith.constant 0 : i32
    %c0_i32_1 = arith.constant 0 : i32
    return %c0_i32, %c0_i32_0 : i32, i32
  }
  func.func @transform_2(%arg0: i32) -> (i32, i32) {
    %c0_i32 = arith.constant 0 : i32
    %c0_i32_0 = arith.constant 0 : i32
    %c0_i32_1 = arith.constant 0 : i32
    return %c0_i32, %c0_i32_0 : i32, i32
  }
  func.func @transform_3(%arg0: i32) -> (i32, i32, i32) {
    %c0_i32 = arith.constant 0 : i32
    %c0_i32_0 = arith.constant 0 : i32
    %c0_i32_1 = arith.constant 0 : i32
    %c0_i32_2 = arith.constant 0 : i32
    return %c0_i32, %c0_i32_0, %c0_i32_1 : i32, i32, i32
  }
}

</mosaic_0001>

<bundles_post_ra>
// kernel: group_norm.1
= control target key start
LH: loop header
LB: loop body
LE: loop exit
PB: predicated region body
PF: predicated region fallthrough
CT: control target
= control target key end

     0   :  { %vm142_vm0 = vcmask 64512   ;;  %s4001_s0 = inlined_call_operand.vmem [shape: f32[128,8,8], index: 0, kind: input, shape index: {}]   ;;  %s4002_s1 = inlined_call_operand.vmem [shape: f32[8,8], index: 1, kind: input, shape index: {}]   ;;  %s4003_s2 = inlined_call_operand.vmem [shape: f32[8,8], index: 2, kind: input, shape index: {}]   ;;  %s4004_s3 = inlined_call_operand.vmem [shape: f32[128,8,8], index: 3, kind: output, shape index: {}]  }
   0x1   :  { %v1285_v0 = vld [vmem:[%s4001_s0] sm:$0xff]  ;;  %v1290_v1 = vld [vmem:[%s4001_s0 + $0x8] sm:$0xff]  ;;  %v1295_v2 = vld [vmem:[%s4001_s0 + $0x10] sm:$0xff] }
   0x2   :  { %v1300_v3 = vld [vmem:[%s4001_s0 + $0x18] sm:$0xff]  ;;  %v143_v4 = vsel %vm142_vm0, %v1285_v0, 0.0  ;;  %v144_v5 = vsel %vm142_vm0, %v1290_v1, 0.0  ;;  %v146_v6 = vsel %vm142_vm0, %v1295_v2, 0.0  ;;  %v1311_v7 = vld [vmem:[%s4001_s0 + $0x20] sm:$0xff]  ;;  %v1318_v10 = vld [vmem:[%s4001_s0 + $0x28] sm:$0xff] }
   0x3   :  { %v145_v8 = vadd.f32 %v144_v5, %v143_v4  ;;  %v148_v9 = vsel %vm142_vm0, %v1300_v3, 0.0  ;;  %v150_v12 = vsel %vm142_vm0, %v1311_v7, 0.0  ;;  %v1325_v13 = vld [vmem:[%s4001_s0 + $0x30] sm:$0xff]  ;;  %v152_v15 = vsel %vm142_vm0, %v1318_v10, 0.0  ;;  %v1332_v16 = vld [vmem:[%s4001_s0 + $0x38] sm:$0xff]  ;;  %v1339_v19 = vld [vmem:[%s4001_s0 + $0x40] sm:$0xff] }
   0x4   :  { %v154_v18 = vsel %vm142_vm0, %v1325_v13, 0.0  ;;  %v156_v21 = vsel %vm142_vm0, %v1332_v16, 0.0  ;;  %v1346_v22 = vld [vmem:[%s4001_s0 + $0x48] sm:$0xff]  ;;  %v158_v24 = vsel %vm142_vm0, %v1339_v19, 0.0  ;;  %v1353_v25 = vld [vmem:[%s4001_s0 + $0x50] sm:$0xff]  ;;  %v1360_v28 = vld [vmem:[%s4001_s0 + $0x58] sm:$0xff] }
   0x5   :  { %v147_v11 = vadd.f32 %v146_v6, %v145_v8  ;;  %v160_v27 = vsel %vm142_vm0, %v1346_v22, 0.0  ;;  %v162_v30 = vsel %vm142_vm0, %v1353_v25, 0.0  ;;  %v1367_v31 = vld [vmem:[%s4001_s0 + $0x60] sm:$0xff]  ;;  %v164_v33 = vsel %vm142_vm0, %v1360_v28, 0.0  ;;  %v1374_v34 = vld [vmem:[%s4001_s0 + $0x68] sm:$0xff]  ;;  %v1381_v37 = vld [vmem:[%s4001_s0 + $0x70] sm:$0xff] }
   0x6   :  { %v166_v36 = vsel %vm142_vm0, %v1367_v31, 0.0  ;;  %v168_v39 = vsel %vm142_vm0, %v1374_v34, 0.0  ;;  %v1388_v40 = vld [vmem:[%s4001_s0 + $0x78] sm:$0xff]  ;;  %v170_v42 = vsel %vm142_vm0, %v1381_v37, 0.0  ;;  %v1395_v43 = vld [vmem:[%s4001_s0 + $0x80] sm:$0xff]  ;;  %v1402_v46 = vld [vmem:[%s4001_s0 + $0x88] sm:$0xff] }
   0x7   :  { %v149_v14 = vadd.f32 %v148_v9, %v147_v11  ;;  %v172_v45 = vsel %vm142_vm0, %v1388_v40, 0.0  ;;  %v174_v48 = vsel %vm142_vm0, %v1395_v43, 0.0  ;;  %v1409_v49 = vld [vmem:[%s4001_s0 + $0x90] sm:$0xff]  ;;  %v176_v51 = vsel %vm142_vm0, %v1402_v46, 0.0  ;;  %v1416_v52 = vld [vmem:[%s4001_s0 + $0x98] sm:$0xff]  ;;  %v1423_v55 = vld [vmem:[%s4001_s0 + $0xa0] sm:$0xff] }
   0x8   :  { %v178_v54 = vsel %vm142_vm0, %v1409_v49, 0.0  ;;  %v180_v57 = vsel %vm142_vm0, %v1416_v52, 0.0  ;;  %v1430_v58 = vld [vmem:[%s4001_s0 + $0xa8] sm:$0xff]  ;;  %v182_v60 = vsel %vm142_vm0, %v1423_v55, 0.0  ;;  %v1437_v61 = vld [vmem:[%s4001_s0 + $0xb0] sm:$0xff]  ;;  %v1444_v4 = vld [vmem:[%s4001_s0 + $0xb8] sm:$0xff] }
   0x9   :  { %v151_v17 = vadd.f32 %v150_v12, %v149_v14  ;;  %v184_v63 = vsel %vm142_vm0, %v1430_v58, 0.0  ;;  %v186_v6 = vsel %vm142_vm0, %v1437_v61, 0.0  ;;  %v1451_v8 = vld [vmem:[%s4001_s0 + $0xc0] sm:$0xff]  ;;  %v188_v11 = vsel %vm142_vm0, %v1444_v4, 0.0  ;;  %v1458_v12 = vld [vmem:[%s4001_s0 + $0xc8] sm:$0xff] }
   0xb   :  { %v153_v20 = vadd.f32 %v152_v15, %v151_v17  ;;  %v190_v15 = vsel %vm142_vm0, %v1451_v8, 0.0  ;;  %v1465_v17 = vld [vmem:[%s4001_s0 + $0xd0] sm:$0xff] }
   0xd   :  { %v155_v23 = vadd.f32 %v154_v18, %v153_v20  ;;  %v192_v20 = vsel %vm142_vm0, %v1458_v12, 0.0 }
   0xf   :  { %v157_v26 = vadd.f32 %v156_v21, %v155_v23  ;;  %v1472_v21 = vld [vmem:[%s4001_s0 + $0xd8] sm:$0xff] }
  0x11   :  { %v159_v29 = vadd.f32 %v158_v24, %v157_v26  ;;  %v194_v24 = vsel %vm142_vm0, %v1465_v17, 0.0  ;;  %v398_v26 = vmul.f32 %v1285_v0, %v1285_v0  ;;  %v1494_v0 = vld [vmem:[%s4001_s0 + $0xe8] sm:$0xff] }
  0x13   :  { %v161_v32 = vadd.f32 %v160_v27, %v159_v29  ;;  %v399_v27 = vmul.f32 %v1290_v1, %v1290_v1  ;;  %v400_v29 = vmul.f32 %v1295_v2, %v1295_v2  ;;  %v402_v2 = vmul.f32 %v1311_v7, %v1311_v7 }
  0x14   :  { %v403_v7 = vmul.f32 %v1318_v10, %v1318_v10  ;;  %v1526_v10 = vld [vmem:[%s4001_s0 + $0x100] sm:$0xff] }
  0x15   :  { %v163_v35 = vadd.f32 %v162_v30, %v161_v32  ;;  %v1485_v30 = vld [vmem:[%s4001_s0 + $0xe0] sm:$0xff] }
  0x17   :  { %v165_v38 = vadd.f32 %v164_v33, %v163_v35  ;;  %v196_v33 = vsel %vm142_vm0, %v1472_v21, 0.0  ;;  %v401_v35 = vmul.f32 %v1300_v3, %v1300_v3  ;;  %v1506_v3 = vld [vmem:[%s4001_s0 + $0xf0] sm:$0xff] }
  0x19   :  { %v167_v41 = vadd.f32 %v166_v36, %v165_v38  ;;  %v198_v36 = vsel %vm142_vm0, %v1485_v30, 0.0  ;;  %v526_v38 = vsel %vm142_vm0, %v398_v26, 0.0 }
  0x1b   :  { %v169_v44 = vadd.f32 %v168_v39, %v167_v41  ;;  %v527_v39 = vsel %vm142_vm0, %v399_v27, 0.0  ;;  %v529_v41 = vsel %vm142_vm0, %v400_v29, 0.0 }
  0x1d   :  { %v171_v47 = vadd.f32 %v170_v42, %v169_v44  ;;  %v528_v44 = vadd.f32 %v527_v39, %v526_v38 }
  0x1f   :  { %v173_v50 = vadd.f32 %v172_v45, %v171_v47  ;;  %v200_v45 = vsel %vm142_vm0, %v1494_v0, 0.0  ;;  %v531_v47 = vsel %vm142_vm0, %v401_v35, 0.0 }
  0x21   :  { %v175_v53 = vadd.f32 %v174_v48, %v173_v50  ;;  %v1516_v48 = vld [vmem:[%s4001_s0 + $0xf8] sm:$0xff] }
  0x23   :  { %v177_v56 = vadd.f32 %v176_v51, %v175_v53  ;;  %v530_v51 = vadd.f32 %v529_v41, %v528_v44  ;;  %v202_v53 = vsel %vm142_vm0, %v1506_v3, 0.0  ;;  %v410_v44 = vmul.f32 %v1367_v31, %v1367_v31  ;;  %v1596_v31 = vld [vmem:[%s4001_s0 + $0x138] sm:$0xff] }
  0x25   :  { %v179_v59 = vadd.f32 %v178_v54, %v177_v56  ;;  %v404_v54 = vmul.f32 %v1325_v13, %v1325_v13  ;;  %v533_v56 = vsel %vm142_vm0, %v402_v2, 0.0  ;;  %v1536_v13 = vld [vmem:[%s4001_s0 + $0x108] sm:$0xff] }
  0x27   :  { %v181_v62 = vadd.f32 %v180_v57, %v179_v59  ;;  %v532_v59 = vadd.f32 %v531_v47, %v530_v51  ;;  %v411_v51 = vmul.f32 %v1374_v34, %v1374_v34  ;;  %v1606_v34 = vld [vmem:[%s4001_s0 + $0x140] sm:$0xff] }
  0x29   :  { %v183_v5 = vadd.f32 %v182_v60, %v181_v62  ;;  %v204_v60 = vsel %vm142_vm0, %v1516_v48, 0.0  ;;  %v405_v62 = vmul.f32 %v1332_v16, %v1332_v16  ;;  %v1546_v16 = vld [vmem:[%s4001_s0 + $0x110] sm:$0xff] }
  0x2a   :  { %v210_v29 = vsel %vm142_vm0, %v1546_v16, 0.0 }
  0x2b   :  { %v185_v9 = vadd.f32 %v184_v63, %v183_v5  ;;  %v535_v63 = vsel %vm142_vm0, %v403_v7, 0.0 }
  0x2d   :  { %v187_v14 = vadd.f32 %v186_v6, %v185_v9  ;;  %v534_v6 = vadd.f32 %v533_v56, %v532_v59  ;;  %v206_v9 = vsel %vm142_vm0, %v1526_v10, 0.0  ;;  %v412_v59 = vmul.f32 %v1381_v37, %v1381_v37  ;;  %v1616_v37 = vld [vmem:[%s4001_s0 + $0x148] sm:$0xff] }
  0x2f   :  { %v189_v18 = vadd.f32 %v188_v11, %v187_v14  ;;  %v406_v11 = vmul.f32 %v1339_v19, %v1339_v19  ;;  %v537_v14 = vsel %vm142_vm0, %v404_v54, 0.0  ;;  %v1556_v19 = vld [vmem:[%s4001_s0 + $0x118] sm:$0xff] }
  0x30   :  { %v212_v2 = vsel %vm142_vm0, %v1556_v19, 0.0 }
  0x31   :  { %v191_v23 = vadd.f32 %v190_v15, %v189_v18  ;;  %v536_v18 = vadd.f32 %v535_v63, %v534_v6  ;;  %v413_v6 = vmul.f32 %v1388_v40, %v1388_v40  ;;  %v1626_v40 = vld [vmem:[%s4001_s0 + $0x150] sm:$0xff] }
  0x33   :  { %v193_v32 = vadd.f32 %v192_v20, %v191_v23  ;;  %v208_v20 = vsel %vm142_vm0, %v1536_v13, 0.0  ;;  %v407_v23 = vmul.f32 %v1346_v22, %v1346_v22  ;;  %v538_v27 = vadd.f32 %v537_v14, %v536_v18  ;;  %v1566_v22 = vld [vmem:[%s4001_s0 + $0x120] sm:$0xff] }
  0x34   :  { %v414_v18 = vmul.f32 %v1395_v43, %v1395_v43  ;;  %v1636_v43 = vld [vmem:[%s4001_s0 + $0x158] sm:$0xff] }
  0x35   :  { %v195_v1 = vadd.f32 %v194_v24, %v193_v32  ;;  %v539_v24 = vsel %vm142_vm0, %v405_v62, 0.0  ;;  %v408_v32 = vmul.f32 %v1353_v25, %v1353_v25  ;;  %v543_v38 = vsel %vm142_vm0, %v407_v23, 0.0  ;;  %v1576_v25 = vld [vmem:[%s4001_s0 + $0x128] sm:$0xff] }
  0x37   :  { %v197_v42 = vadd.f32 %v196_v33, %v195_v1  ;;  %v541_v33 = vsel %vm142_vm0, %v406_v11, 0.0  ;;  %v540_v1 = vadd.f32 %v539_v24, %v538_v27  ;;  %v415_v27 = vmul.f32 %v1402_v46, %v1402_v46  ;;  %v1646_v46 = vld [vmem:[%s4001_s0 + $0x160] sm:$0xff] }
  0x39   :  { %v199_v50 = vadd.f32 %v198_v36, %v197_v42  ;;  %v409_v36 = vmul.f32 %v1360_v28, %v1360_v28  ;;  %v542_v41 = vadd.f32 %v541_v33, %v540_v1  ;;  %v214_v42 = vsel %vm142_vm0, %v1566_v22, 0.0  ;;  %v1586_v28 = vld [vmem:[%s4001_s0 + $0x130] sm:$0xff] }
  0x3a   :  { %v416_v1 = vmul.f32 %v1409_v49, %v1409_v49  ;;  %v1656_v49 = vld [vmem:[%s4001_s0 + $0x168] sm:$0xff] }
  0x3b   :  { %v201_v57 = vadd.f32 %v200_v45, %v199_v50  ;;  %v545_v45 = vsel %vm142_vm0, %v408_v32, 0.0  ;;  %v544_v47 = vadd.f32 %v543_v38, %v542_v41  ;;  %v216_v50 = vsel %vm142_vm0, %v1576_v25, 0.0 }
  0x3c   :  { %v417_v41 = vmul.f32 %v1416_v52, %v1416_v52  ;;  %v1666_v52 = vld [vmem:[%s4001_s0 + $0x170] sm:$0xff] }
  0x3d   :  { %v203_v5 = vadd.f32 %v202_v53, %v201_v57  ;;  %v547_v53 = vsel %vm142_vm0, %v409_v36, 0.0  ;;  %v546_v56 = vadd.f32 %v545_v45, %v544_v47  ;;  %v218_v57 = vsel %vm142_vm0, %v1586_v28, 0.0 }
  0x3e   :  { %v418_v47 = vmul.f32 %v1423_v55, %v1423_v55  ;;  %v1676_v55 = vld [vmem:[%s4001_s0 + $0x178] sm:$0xff] }
  0x3f   :  { %v205_v15 = vadd.f32 %v204_v60, %v203_v5  ;;  %v549_v60 = vsel %vm142_vm0, %v410_v44, 0.0  ;;  %v548_v63 = vadd.f32 %v547_v53, %v546_v56  ;;  %v220_v5 = vsel %vm142_vm0, %v1596_v31, 0.0 }
  0x40   :  { %v419_v56 = vmul.f32 %v1430_v58, %v1430_v58  ;;  %v1686_v58 = vld [vmem:[%s4001_s0 + $0x180] sm:$0xff] }
  0x41   :  { %v207_v26 = vadd.f32 %v206_v9, %v205_v15  ;;  %v551_v9 = vsel %vm142_vm0, %v411_v51, 0.0  ;;  %v550_v14 = vadd.f32 %v549_v60, %v548_v63  ;;  %v222_v15 = vsel %vm142_vm0, %v1606_v34, 0.0 }
  0x42   :  { %v420_v63 = vmul.f32 %v1437_v61, %v1437_v61  ;;  %v1696_v61 = vld [vmem:[%s4001_s0 + $0x188] sm:$0xff] }
  0x43   :  { %v209_v35 = vadd.f32 %v208_v20, %v207_v26  ;;  %v553_v20 = vsel %vm142_vm0, %v412_v59, 0.0  ;;  %v552_v24 = vadd.f32 %v551_v9, %v550_v14  ;;  %v224_v26 = vsel %vm142_vm0, %v1616_v37, 0.0 }
  0x44   :  { %v421_v14 = vmul.f32 %v1444_v4, %v1444_v4  ;;  %v1706_v4 = vld [vmem:[%s4001_s0 + $0x190] sm:$0xff] }
  0x45   :  { %v211_v39 = vadd.f32 %v210_v29, %v209_v35  ;;  %v555_v29 = vsel %vm142_vm0, %v413_v6, 0.0  ;;  %v554_v33 = vadd.f32 %v553_v20, %v552_v24  ;;  %v226_v35 = vsel %vm142_vm0, %v1626_v40, 0.0 }
  0x46   :  { %v422_v24 = vmul.f32 %v1451_v8, %v1451_v8  ;;  %v1716_v8 = vld [vmem:[%s4001_s0 + $0x198] sm:$0xff] }
  0x47   :  { %v213_v7 = vadd.f32 %v212_v2, %v211_v39  ;;  %v557_v2 = vsel %vm142_vm0, %v414_v18, 0.0  ;;  %v556_v38 = vadd.f32 %v555_v29, %v554_v33  ;;  %v228_v39 = vsel %vm142_vm0, %v1636_v43, 0.0 }
  0x48   :  { %v423_v33 = vmul.f32 %v1458_v12, %v1458_v12  ;;  %v1726_v12 = vld [vmem:[%s4001_s0 + $0x1a0] sm:$0xff] }
  0x49   :  { %v215_v54 = vadd.f32 %v214_v42, %v213_v7  ;;  %v559_v42 = vsel %vm142_vm0, %v415_v27, 0.0  ;;  %v558_v45 = vadd.f32 %v557_v2, %v556_v38  ;;  %v230_v7 = vsel %vm142_vm0, %v1646_v46, 0.0 }
  0x4a   :  { %v424_v38 = vmul.f32 %v1465_v17, %v1465_v17  ;;  %v1736_v17 = vld [vmem:[%s4001_s0 + $0x1a8] sm:$0xff] }
  0x4b   :  { %v217_v62 = vadd.f32 %v216_v50, %v215_v54  ;;  %v561_v50 = vsel %vm142_vm0, %v416_v1, 0.0  ;;  %v560_v53 = vadd.f32 %v559_v42, %v558_v45  ;;  %v232_v54 = vsel %vm142_vm0, %v1656_v49, 0.0 }
  0x4c   :  { %v425_v45 = vmul.f32 %v1472_v21, %v1472_v21  ;;  %v1746_v21 = vld [vmem:[%s4001_s0 + $0x1b0] sm:$0xff] }
  0x4d   :  { %v219_v11 = vadd.f32 %v218_v57, %v217_v62  ;;  %v563_v57 = vsel %vm142_vm0, %v417_v41, 0.0  ;;  %v562_v60 = vadd.f32 %v561_v50, %v560_v53  ;;  %v234_v62 = vsel %vm142_vm0, %v1666_v52, 0.0 }
  0x4e   :  { %v426_v53 = vmul.f32 %v1485_v30, %v1485_v30  ;;  %v1756_v30 = vld [vmem:[%s4001_s0 + $0x1b8] sm:$0xff] }
  0x4f   :  { %v221_v23 = vadd.f32 %v220_v5, %v219_v11  ;;  %v565_v5 = vsel %vm142_vm0, %v418_v47, 0.0  ;;  %v564_v9 = vadd.f32 %v563_v57, %v562_v60  ;;  %v236_v11 = vsel %vm142_vm0, %v1676_v55, 0.0 }
  0x50   :  { %v427_v60 = vmul.f32 %v1494_v0, %v1494_v0  ;;  %v1766_v0 = vld [vmem:[%s4001_s0 + $0x1c0] sm:$0xff] }
  0x51   :  { %v223_v32 = vadd.f32 %v222_v15, %v221_v23  ;;  %v567_v15 = vsel %vm142_vm0, %v419_v56, 0.0  ;;  %v566_v20 = vadd.f32 %v565_v5, %v564_v9  ;;  %v238_v23 = vsel %vm142_vm0, %v1686_v58, 0.0 }
  0x52   :  { %v428_v9 = vmul.f32 %v1506_v3, %v1506_v3  ;;  %v1776_v3 = vld [vmem:[%s4001_s0 + $0x1c8] sm:$0xff] }
  0x53   :  { %v225_v36 = vadd.f32 %v224_v26, %v223_v32  ;;  %v569_v26 = vsel %vm142_vm0, %v420_v63, 0.0  ;;  %v568_v29 = vadd.f32 %v567_v15, %v566_v20  ;;  %v240_v32 = vsel %vm142_vm0, %v1696_v61, 0.0 }
  0x54   :  { %v429_v20 = vmul.f32 %v1516_v48, %v1516_v48  ;;  %v1786_v48 = vld [vmem:[%s4001_s0 + $0x1d0] sm:$0xff] }
  0x55   :  { %v227_v44 = vadd.f32 %v226_v35, %v225_v36  ;;  %v571_v35 = vsel %vm142_vm0, %v421_v14, 0.0  ;;  %v570_v2 = vadd.f32 %v569_v26, %v568_v29  ;;  %v242_v36 = vsel %vm142_vm0, %v1706_v4, 0.0 }
  0x56   :  { %v430_v29 = vmul.f32 %v1526_v10, %v1526_v10  ;;  %v1796_v10 = vld [vmem:[%s4001_s0 + $0x1d8] sm:$0xff] }
  0x57   :  { %v229_v51 = vadd.f32 %v228_v39, %v227_v44  ;;  %v573_v39 = vsel %vm142_vm0, %v422_v24, 0.0  ;;  %v572_v42 = vadd.f32 %v571_v35, %v570_v2  ;;  %v244_v44 = vsel %vm142_vm0, %v1716_v8, 0.0 }
  0x58   :  { %v431_v2 = vmul.f32 %v1536_v13, %v1536_v13  ;;  %v1806_v13 = vld [vmem:[%s4001_s0 + $0x1e0] sm:$0xff] }
  0x59   :  { %v231_v59 = vadd.f32 %v230_v7, %v229_v51  ;;  %v575_v7 = vsel %vm142_vm0, %v423_v33, 0.0  ;;  %v574_v50 = vadd.f32 %v573_v39, %v572_v42  ;;  %v246_v51 = vsel %vm142_vm0, %v1726_v12, 0.0 }
  0x5a   :  { %v432_v42 = vmul.f32 %v1546_v16, %v1546_v16  ;;  %v1816_v16 = vld [vmem:[%s4001_s0 + $0x1e8] sm:$0xff] }
  0x5b   :  { %v233_v6 = vadd.f32 %v232_v54, %v231_v59  ;;  %v577_v54 = vsel %vm142_vm0, %v424_v38, 0.0  ;;  %v576_v57 = vadd.f32 %v575_v7, %v574_v50  ;;  %v248_v59 = vsel %vm142_vm0, %v1736_v17, 0.0 }
  0x5c   :  { %v433_v50 = vmul.f32 %v1556_v19, %v1556_v19  ;;  %v1826_v19 = vld [vmem:[%s4001_s0 + $0x1f0] sm:$0xff] }
  0x5d   :  { %v235_v18 = vadd.f32 %v234_v62, %v233_v6  ;;  %v579_v62 = vsel %vm142_vm0, %v425_v45, 0.0  ;;  %v578_v5 = vadd.f32 %v577_v54, %v576_v57  ;;  %v250_v6 = vsel %vm142_vm0, %v1746_v21, 0.0 }
  0x5e   :  { %v434_v57 = vmul.f32 %v1566_v22, %v1566_v22  ;;  %v1836_v22 = vld [vmem:[%s4001_s0 + $0x1f8] sm:$0xff] }
  0x5f   :  { %v237_v27 = vadd.f32 %v236_v11, %v235_v18  ;;  %v581_v11 = vsel %vm142_vm0, %v426_v53, 0.0  ;;  %v580_v15 = vadd.f32 %v579_v62, %v578_v5  ;;  %v252_v18 = vsel %vm142_vm0, %v1756_v30, 0.0 }
  0x60   :  { %v435_v5 = vmul.f32 %v1576_v25, %v1576_v25  ;;  %v1846_v25 = vld [vmem:[%s4001_s0 + $0x200] sm:$0xff] }
  0x61   :  { %v239_v1 = vadd.f32 %v238_v23, %v237_v27  ;;  %v583_v23 = vsel %vm142_vm0, %v427_v60, 0.0  ;;  %v582_v26 = vadd.f32 %v581_v11, %v580_v15  ;;  %v254_v27 = vsel %vm142_vm0, %v1766_v0, 0.0 }
  0x62   :  { %v436_v15 = vmul.f32 %v1586_v28, %v1586_v28  ;;  %v1856_v28 = vld [vmem:[%s4001_s0 + $0x208] sm:$0xff] }
  0x63   :  { %v241_v41 = vadd.f32 %v240_v32, %v239_v1  ;;  %v585_v32 = vsel %vm142_vm0, %v428_v9, 0.0  ;;  %v584_v35 = vadd.f32 %v583_v23, %v582_v26  ;;  %v256_v1 = vsel %vm142_vm0, %v1776_v3, 0.0 }
  0x64   :  { %v437_v26 = vmul.f32 %v1596_v31, %v1596_v31  ;;  %v1866_v31 = vld [vmem:[%s4001_s0 + $0x210] sm:$0xff] }
  0x65   :  { %v243_v47 = vadd.f32 %v242_v36, %v241_v41  ;;  %v587_v36 = vsel %vm142_vm0, %v429_v20, 0.0  ;;  %v586_v39 = vadd.f32 %v585_v32, %v584_v35  ;;  %v258_v41 = vsel %vm142_vm0, %v1786_v48, 0.0 }
  0x66   :  { %v438_v35 = vmul.f32 %v1606_v34, %v1606_v34  ;;  %v1876_v34 = vld [vmem:[%s4001_s0 + $0x218] sm:$0xff] }
  0x67   :  { %v245_v56 = vadd.f32 %v244_v44, %v243_v47  ;;  %v589_v44 = vsel %vm142_vm0, %v430_v29, 0.0  ;;  %v588_v7 = vadd.f32 %v587_v36, %v586_v39  ;;  %v260_v47 = vsel %vm142_vm0, %v1796_v10, 0.0 }
  0x68   :  { %v439_v39 = vmul.f32 %v1616_v37, %v1616_v37  ;;  %v1886_v37 = vld [vmem:[%s4001_s0 + $0x220] sm:$0xff] }
  0x69   :  { %v247_v63 = vadd.f32 %v246_v51, %v245_v56  ;;  %v591_v51 = vsel %vm142_vm0, %v431_v2, 0.0  ;;  %v590_v54 = vadd.f32 %v589_v44, %v588_v7  ;;  %v262_v56 = vsel %vm142_vm0, %v1806_v13, 0.0 }
  0x6a   :  { %v440_v7 = vmul.f32 %v1626_v40, %v1626_v40  ;;  %v1896_v40 = vld [vmem:[%s4001_s0 + $0x228] sm:$0xff] }
  0x6b   :  { %v249_v14 = vadd.f32 %v248_v59, %v247_v63  ;;  %v593_v59 = vsel %vm142_vm0, %v432_v42, 0.0  ;;  %v592_v62 = vadd.f32 %v591_v51, %v590_v54  ;;  %v264_v63 = vsel %vm142_vm0, %v1816_v16, 0.0 }
  0x6c   :  { %v441_v54 = vmul.f32 %v1636_v43, %v1636_v43  ;;  %v1906_v43 = vld [vmem:[%s4001_s0 + $0x230] sm:$0xff] }
  0x6d   :  { %v251_v24 = vadd.f32 %v250_v6, %v249_v14  ;;  %v595_v6 = vsel %vm142_vm0, %v433_v50, 0.0  ;;  %v594_v11 = vadd.f32 %v593_v59, %v592_v62  ;;  %v266_v14 = vsel %vm142_vm0, %v1826_v19, 0.0 }
  0x6e   :  { %v442_v62 = vmul.f32 %v1646_v46, %v1646_v46  ;;  %v1916_v46 = vld [vmem:[%s4001_s0 + $0x238] sm:$0xff] }
  0x6f   :  { %v253_v33 = vadd.f32 %v252_v18, %v251_v24  ;;  %v597_v18 = vsel %vm142_vm0, %v434_v57, 0.0  ;;  %v596_v23 = vadd.f32 %v595_v6, %v594_v11  ;;  %v268_v24 = vsel %vm142_vm0, %v1836_v22, 0.0 }
  0x70   :  { %v443_v11 = vmul.f32 %v1656_v49, %v1656_v49  ;;  %v1926_v49 = vld [vmem:[%s4001_s0 + $0x240] sm:$0xff] }
  0x71   :  { %v255_v38 = vadd.f32 %v254_v27, %v253_v33  ;;  %v599_v27 = vsel %vm142_vm0, %v435_v5, 0.0  ;;  %v598_v32 = vadd.f32 %v597_v18, %v596_v23  ;;  %v270_v33 = vsel %vm142_vm0, %v1846_v25, 0.0 }
  0x72   :  { %v444_v23 = vmul.f32 %v1666_v52, %v1666_v52  ;;  %v1936_v52 = vld [vmem:[%s4001_s0 + $0x248] sm:$0xff] }
  0x73   :  { %v257_v45 = vadd.f32 %v256_v1, %v255_v38  ;;  %v601_v1 = vsel %vm142_vm0, %v436_v15, 0.0  ;;  %v600_v36 = vadd.f32 %v599_v27, %v598_v32  ;;  %v272_v38 = vsel %vm142_vm0, %v1856_v28, 0.0 }
  0x74   :  { %v445_v32 = vmul.f32 %v1676_v55, %v1676_v55  ;;  %v1946_v55 = vld [vmem:[%s4001_s0 + $0x250] sm:$0xff] }
  0x75   :  { %v259_v53 = vadd.f32 %v258_v41, %v257_v45  ;;  %v603_v41 = vsel %vm142_vm0, %v437_v26, 0.0  ;;  %v602_v44 = vadd.f32 %v601_v1, %v600_v36  ;;  %v274_v45 = vsel %vm142_vm0, %v1866_v31, 0.0 }
  0x76   :  { %v446_v36 = vmul.f32 %v1686_v58, %v1686_v58  ;;  %v1956_v58 = vld [vmem:[%s4001_s0 + $0x258] sm:$0xff] }
  0x77   :  { %v261_v60 = vadd.f32 %v260_v47, %v259_v53  ;;  %v605_v47 = vsel %vm142_vm0, %v438_v35, 0.0  ;;  %v604_v51 = vadd.f32 %v603_v41, %v602_v44  ;;  %v276_v53 = vsel %vm142_vm0, %v1876_v34, 0.0 }
  0x78   :  { %v447_v44 = vmul.f32 %v1696_v61, %v1696_v61  ;;  %v1966_v61 = vld [vmem:[%s4001_s0 + $0x260] sm:$0xff] }
  0x79   :  { %v263_v9 = vadd.f32 %v262_v56, %v261_v60  ;;  %v607_v56 = vsel %vm142_vm0, %v439_v39, 0.0  ;;  %v606_v59 = vadd.f32 %v605_v47, %v604_v51  ;;  %v278_v60 = vsel %vm142_vm0, %v1886_v37, 0.0 }
  0x7a   :  { %v448_v51 = vmul.f32 %v1706_v4, %v1706_v4  ;;  %v1976_v4 = vld [vmem:[%s4001_s0 + $0x268] sm:$0xff] }
  0x7b   :  { %v265_v20 = vadd.f32 %v264_v63, %v263_v9  ;;  %v609_v63 = vsel %vm142_vm0, %v440_v7, 0.0  ;;  %v608_v6 = vadd.f32 %v607_v56, %v606_v59  ;;  %v280_v9 = vsel %vm142_vm0, %v1896_v40, 0.0 }
  0x7c   :  { %v449_v59 = vmul.f32 %v1716_v8, %v1716_v8  ;;  %v1986_v8 = vld [vmem:[%s4001_s0 + $0x270] sm:$0xff] }
  0x7d   :  { %v267_v29 = vadd.f32 %v266_v14, %v265_v20  ;;  %v611_v14 = vsel %vm142_vm0, %v441_v54, 0.0  ;;  %v610_v18 = vadd.f32 %v609_v63, %v608_v6  ;;  %v282_v20 = vsel %vm142_vm0, %v1906_v43, 0.0 }
  0x7e   :  { %v450_v6 = vmul.f32 %v1726_v12, %v1726_v12  ;;  %v1996_v12 = vld [vmem:[%s4001_s0 + $0x278] sm:$0xff] }
  0x7f   :  { %v269_v2 = vadd.f32 %v268_v24, %v267_v29  ;;  %v613_v24 = vsel %vm142_vm0, %v442_v62, 0.0  ;;  %v612_v27 = vadd.f32 %v611_v14, %v610_v18  ;;  %v284_v29 = vsel %vm142_vm0, %v1916_v46, 0.0 }
  0x80   :  { %v451_v18 = vmul.f32 %v1736_v17, %v1736_v17  ;;  %v2006_v17 = vld [vmem:[%s4001_s0 + $0x280] sm:$0xff] }
  0x81   :  { %v271_v42 = vadd.f32 %v270_v33, %v269_v2  ;;  %v615_v33 = vsel %vm142_vm0, %v443_v11, 0.0  ;;  %v614_v1 = vadd.f32 %v613_v24, %v612_v27  ;;  %v286_v2 = vsel %vm142_vm0, %v1926_v49, 0.0 }
  0x82   :  { %v452_v27 = vmul.f32 %v1746_v21, %v1746_v21  ;;  %v2016_v21 = vld [vmem:[%s4001_s0 + $0x288] sm:$0xff] }
  0x83   :  { %v273_v50 = vadd.f32 %v272_v38, %v271_v42  ;;  %v617_v38 = vsel %vm142_vm0, %v444_v23, 0.0  ;;  %v616_v41 = vadd.f32 %v615_v33, %v614_v1  ;;  %v288_v42 = vsel %vm142_vm0, %v1936_v52, 0.0 }
  0x84   :  { %v453_v1 = vmul.f32 %v1756_v30, %v1756_v30  ;;  %v2026_v30 = vld [vmem:[%s4001_s0 + $0x290] sm:$0xff] }
  0x85   :  { %v275_v57 = vadd.f32 %v274_v45, %v273_v50  ;;  %v619_v45 = vsel %vm142_vm0, %v445_v32, 0.0  ;;  %v618_v47 = vadd.f32 %v617_v38, %v616_v41  ;;  %v290_v50 = vsel %vm142_vm0, %v1946_v55, 0.0 }
  0x86   :  { %v454_v41 = vmul.f32 %v1766_v0, %v1766_v0  ;;  %v2036_v0 = vld [vmem:[%s4001_s0 + $0x298] sm:$0xff] }
  0x87   :  { %v277_v5 = vadd.f32 %v276_v53, %v275_v57  ;;  %v621_v53 = vsel %vm142_vm0, %v446_v36, 0.0  ;;  %v620_v56 = vadd.f32 %v619_v45, %v618_v47  ;;  %v292_v57 = vsel %vm142_vm0, %v1956_v58, 0.0 }
  0x88   :  { %v455_v47 = vmul.f32 %v1776_v3, %v1776_v3  ;;  %v2046_v3 = vld [vmem:[%s4001_s0 + $0x2a0] sm:$0xff] }
  0x89   :  { %v279_v15 = vadd.f32 %v278_v60, %v277_v5  ;;  %v623_v60 = vsel %vm142_vm0, %v447_v44, 0.0  ;;  %v622_v63 = vadd.f32 %v621_v53, %v620_v56  ;;  %v294_v5 = vsel %vm142_vm0, %v1966_v61, 0.0 }
  0x8a   :  { %v456_v56 = vmul.f32 %v1786_v48, %v1786_v48  ;;  %v2056_v48 = vld [vmem:[%s4001_s0 + $0x2a8] sm:$0xff] }
  0x8b   :  { %v281_v26 = vadd.f32 %v280_v9, %v279_v15  ;;  %v625_v9 = vsel %vm142_vm0, %v448_v51, 0.0  ;;  %v624_v14 = vadd.f32 %v623_v60, %v622_v63  ;;  %v296_v15 = vsel %vm142_vm0, %v1976_v4, 0.0 }
  0x8c   :  { %v457_v63 = vmul.f32 %v1796_v10, %v1796_v10  ;;  %v2066_v10 = vld [vmem:[%s4001_s0 + $0x2b0] sm:$0xff] }
  0x8d   :  { %v283_v35 = vadd.f32 %v282_v20, %v281_v26  ;;  %v627_v20 = vsel %vm142_vm0, %v449_v59, 0.0  ;;  %v626_v24 = vadd.f32 %v625_v9, %v624_v14  ;;  %v298_v26 = vsel %vm142_vm0, %v1986_v8, 0.0 }
  0x8e   :  { %v458_v14 = vmul.f32 %v1806_v13, %v1806_v13  ;;  %v2076_v13 = vld [vmem:[%s4001_s0 + $0x2b8] sm:$0xff] }
  0x8f   :  { %v285_v39 = vadd.f32 %v284_v29, %v283_v35  ;;  %v629_v29 = vsel %vm142_vm0, %v450_v6, 0.0  ;;  %v628_v33 = vadd.f32 %v627_v20, %v626_v24  ;;  %v300_v35 = vsel %vm142_vm0, %v1996_v12, 0.0 }
  0x90   :  { %v459_v24 = vmul.f32 %v1816_v16, %v1816_v16  ;;  %v2086_v16 = vld [vmem:[%s4001_s0 + $0x2c0] sm:$0xff] }
  0x91   :  { %v287_v7 = vadd.f32 %v286_v2, %v285_v39  ;;  %v631_v2 = vsel %vm142_vm0, %v451_v18, 0.0  ;;  %v630_v38 = vadd.f32 %v629_v29, %v628_v33  ;;  %v302_v39 = vsel %vm142_vm0, %v2006_v17, 0.0 }
  0x92   :  { %v460_v33 = vmul.f32 %v1826_v19, %v1826_v19  ;;  %v2096_v19 = vld [vmem:[%s4001_s0 + $0x2c8] sm:$0xff] }
  0x93   :  { %v289_v54 = vadd.f32 %v288_v42, %v287_v7  ;;  %v633_v42 = vsel %vm142_vm0, %v452_v27, 0.0  ;;  %v632_v45 = vadd.f32 %v631_v2, %v630_v38  ;;  %v304_v7 = vsel %vm142_vm0, %v2016_v21, 0.0 }
  0x94   :  { %v461_v38 = vmul.f32 %v1836_v22, %v1836_v22  ;;  %v2106_v22 = vld [vmem:[%s4001_s0 + $0x2d0] sm:$0xff] }
  0x95   :  { %v291_v62 = vadd.f32 %v290_v50, %v289_v54  ;;  %v635_v50 = vsel %vm142_vm0, %v453_v1, 0.0  ;;  %v634_v53 = vadd.f32 %v633_v42, %v632_v45  ;;  %v306_v54 = vsel %vm142_vm0, %v2026_v30, 0.0 }
  0x96   :  { %v462_v45 = vmul.f32 %v1846_v25, %v1846_v25  ;;  %v2116_v25 = vld [vmem:[%s4001_s0 + $0x2d8] sm:$0xff] }
  0x97   :  { %v293_v11 = vadd.f32 %v292_v57, %v291_v62  ;;  %v637_v57 = vsel %vm142_vm0, %v454_v41, 0.0  ;;  %v636_v60 = vadd.f32 %v635_v50, %v634_v53  ;;  %v308_v62 = vsel %vm142_vm0, %v2036_v0, 0.0 }
  0x98   :  { %v463_v53 = vmul.f32 %v1856_v28, %v1856_v28  ;;  %v2126_v28 = vld [vmem:[%s4001_s0 + $0x2e0] sm:$0xff] }
  0x99   :  { %v295_v23 = vadd.f32 %v294_v5, %v293_v11  ;;  %v639_v5 = vsel %vm142_vm0, %v455_v47, 0.0  ;;  %v638_v9 = vadd.f32 %v637_v57, %v636_v60  ;;  %v310_v11 = vsel %vm142_vm0, %v2046_v3, 0.0  ;;  %4017 = vst [vmem:[#allocation2_spill] sm:$0xff] %v2126_v28 }
  0x9a   :  { %v464_v60 = vmul.f32 %v1866_v31, %v1866_v31  ;;  %v2136_v31 = vld [vmem:[%s4001_s0 + $0x2e8] sm:$0xff] }
  0x9b   :  { %v297_v32 = vadd.f32 %v296_v15, %v295_v23  ;;  %v641_v15 = vsel %vm142_vm0, %v456_v56, 0.0  ;;  %v640_v20 = vadd.f32 %v639_v5, %v638_v9  ;;  %v312_v23 = vsel %vm142_vm0, %v2056_v48, 0.0  ;;  %4018 = vst [vmem:[#allocation3_spill] sm:$0xff] %v2136_v31 }
  0x9c   :  { %v465_v9 = vmul.f32 %v1876_v34, %v1876_v34  ;;  %v2146_v34 = vld [vmem:[%s4001_s0 + $0x2f0] sm:$0xff] }
  0x9d   :  { %v299_v36 = vadd.f32 %v298_v26, %v297_v32  ;;  %v643_v26 = vsel %vm142_vm0, %v457_v63, 0.0  ;;  %v642_v29 = vadd.f32 %v641_v15, %v640_v20  ;;  %v314_v32 = vsel %vm142_vm0, %v2066_v10, 0.0  ;;  %4019 = vst [vmem:[#allocation4_spill] sm:$0xff] %v2146_v34 }
  0x9e   :  { %v466_v20 = vmul.f32 %v1886_v37, %v1886_v37  ;;  %v2156_v37 = vld [vmem:[%s4001_s0 + $0x2f8] sm:$0xff] }
  0x9f   :  { %v301_v44 = vadd.f32 %v300_v35, %v299_v36  ;;  %v645_v35 = vsel %vm142_vm0, %v458_v14, 0.0  ;;  %v644_v2 = vadd.f32 %v643_v26, %v642_v29  ;;  %v316_v36 = vsel %vm142_vm0, %v2076_v13, 0.0  ;;  %4020 = vst [vmem:[#allocation5_spill] sm:$0xff] %v2156_v37 }
  0xa0   :  { %v467_v29 = vmul.f32 %v1896_v40, %v1896_v40  ;;  %v2166_v40 = vld [vmem:[%s4001_s0 + $0x300] sm:$0xff] }
  0xa1   :  { %v303_v51 = vadd.f32 %v302_v39, %v301_v44  ;;  %v647_v39 = vsel %vm142_vm0, %v459_v24, 0.0  ;;  %v646_v42 = vadd.f32 %v645_v35, %v644_v2  ;;  %v318_v44 = vsel %vm142_vm0, %v2086_v16, 0.0  ;;  %4021 = vst [vmem:[#allocation6_spill] sm:$0xff] %v2166_v40 }
  0xa2   :  { %v468_v2 = vmul.f32 %v1906_v43, %v1906_v43  ;;  %v2176_v43 = vld [vmem:[%s4001_s0 + $0x308] sm:$0xff] }
  0xa3   :  { %v305_v59 = vadd.f32 %v304_v7, %v303_v51  ;;  %v649_v7 = vsel %vm142_vm0, %v460_v33, 0.0  ;;  %v648_v50 = vadd.f32 %v647_v39, %v646_v42  ;;  %v320_v51 = vsel %vm142_vm0, %v2096_v19, 0.0  ;;  %4022 = vst [vmem:[#allocation7_spill] sm:$0xff] %v2176_v43 }
  0xa4   :  { %v469_v42 = vmul.f32 %v1916_v46, %v1916_v46  ;;  %v2186_v46 = vld [vmem:[%s4001_s0 + $0x310] sm:$0xff] }
  0xa5   :  { %v307_v6 = vadd.f32 %v306_v54, %v305_v59  ;;  %v651_v54 = vsel %vm142_vm0, %v461_v38, 0.0  ;;  %v650_v57 = vadd.f32 %v649_v7, %v648_v50  ;;  %v322_v59 = vsel %vm142_vm0, %v2106_v22, 0.0  ;;  %4023 = vst [vmem:[#allocation8_spill] sm:$0xff] %v2186_v46 }
  0xa6   :  { %v470_v50 = vmul.f32 %v1926_v49, %v1926_v49  ;;  %v2196_v49 = vld [vmem:[%s4001_s0 + $0x318] sm:$0xff] }
  0xa7   :  { %v309_v18 = vadd.f32 %v308_v62, %v307_v6  ;;  %v653_v62 = vsel %vm142_vm0, %v462_v45, 0.0  ;;  %v652_v5 = vadd.f32 %v651_v54, %v650_v57  ;;  %v324_v6 = vsel %vm142_vm0, %v2116_v25, 0.0  ;;  %4024 = vst [vmem:[#allocation9_spill] sm:$0xff] %v2196_v49 }
  0xa8   :  { %v471_v57 = vmul.f32 %v1936_v52, %v1936_v52 }
  0xa9   :  { %v311_v27 = vadd.f32 %v310_v11, %v309_v18  ;;  %v655_v11 = vsel %vm142_vm0, %v463_v53, 0.0  ;;  %v654_v15 = vadd.f32 %v653_v62, %v652_v5  ;;  %v326_v18 = vsel %vm142_vm0, %v2126_v28, 0.0 }
  0xaa   :  { %v472_v5 = vmul.f32 %v1946_v55, %v1946_v55 }
  0xab   :  { %v313_v1 = vadd.f32 %v312_v23, %v311_v27  ;;  %v657_v23 = vsel %vm142_vm0, %v464_v60, 0.0  ;;  %v656_v26 = vadd.f32 %v655_v11, %v654_v15  ;;  %v328_v27 = vsel %vm142_vm0, %v2136_v31, 0.0 }
  0xac   :  { %v340_v15 = vsel %vm142_vm0, %v2196_v49, 0.0 }
  0xad   :  { %v315_v41 = vadd.f32 %v314_v32, %v313_v1  ;;  %v659_v32 = vsel %vm142_vm0, %v465_v9, 0.0  ;;  %v658_v35 = vadd.f32 %v657_v23, %v656_v26  ;;  %v330_v1 = vsel %vm142_vm0, %v2146_v34, 0.0  ;;  %v2206_v9 = vld [vmem:[%s4001_s0 + $0x320] sm:$0xff]  ;;  %v2216_v23 = vld [vmem:[%s4001_s0 + $0x328] sm:$0xff] }
  0xae   :  { %4025 = vst [vmem:[#allocation10_spill] sm:$0xff] %v2206_v9  ;;  %4026 = vst [vmem:[#allocation11_spill] sm:$0xff] %v2216_v23 }
  0xaf   :  { %v317_v47 = vadd.f32 %v316_v36, %v315_v41  ;;  %v661_v36 = vsel %vm142_vm0, %v466_v20, 0.0  ;;  %v660_v39 = vadd.f32 %v659_v32, %v658_v35  ;;  %v332_v41 = vsel %vm142_vm0, %v2156_v37, 0.0 }
  0xb0   :  { %v671_v20 = vsel %vm142_vm0, %v471_v57, 0.0  ;;  %v673_v32 = vsel %vm142_vm0, %v472_v5, 0.0  ;;  %v2256_v57 = vld [vmem:[%s4001_s0 + $0x348] sm:$0xff] }
  0xb1   :  { %v319_v56 = vadd.f32 %v318_v44, %v317_v47  ;;  %v663_v44 = vsel %vm142_vm0, %v467_v29, 0.0  ;;  %v662_v7 = vadd.f32 %v661_v36, %v660_v39  ;;  %v334_v47 = vsel %vm142_vm0, %v2166_v40, 0.0  ;;  %v2236_v39 = vld [vmem:[%s4001_s0 + $0x338] sm:$0xff] }
  0xb2   :  { %v474_v29 = vmul.f32 %v1966_v61, %v1966_v61  ;;  %v475_v36 = vmul.f32 %v1976_v4, %v1976_v4 }
  0xb3   :  { %v321_v63 = vadd.f32 %v320_v51, %v319_v56  ;;  %v665_v51 = vsel %vm142_vm0, %v468_v2, 0.0  ;;  %v664_v54 = vadd.f32 %v663_v44, %v662_v7  ;;  %v336_v56 = vsel %vm142_vm0, %v2176_v43, 0.0 }
  0xb4   :  { %v344_v2 = vsel %vm142_vm0, %v2216_v23, 0.0  ;;  %v677_v7 = vsel %vm142_vm0, %v474_v29, 0.0 }
  0xb5   :  { %v323_v14 = vadd.f32 %v322_v59, %v321_v63  ;;  %v667_v59 = vsel %vm142_vm0, %v469_v42, 0.0  ;;  %v666_v62 = vadd.f32 %v665_v51, %v664_v54  ;;  %v338_v63 = vsel %vm142_vm0, %v2186_v46, 0.0 }
  0xb6   :  { %v477_v54 = vmul.f32 %v1996_v12, %v1996_v12 }
  0xb7   :  { %v325_v24 = vadd.f32 %v324_v6, %v323_v14  ;;  %v669_v6 = vsel %vm142_vm0, %v470_v50, 0.0  ;;  %v668_v14 = vadd.f32 %v667_v59, %v666_v62 }
  0xb9   :  { %v327_v33 = vadd.f32 %v326_v18, %v325_v24  ;;  %v473_v18 = vmul.f32 %v1956_v58, %v1956_v58  ;;  %v670_v26 = vadd.f32 %v669_v6, %v668_v14  ;;  %v2266_v6 = vld [vmem:[%s4001_s0 + $0x350] sm:$0xff] }
  0xba   :  { %v354_v29 = vsel %vm142_vm0, %v2266_v6, 0.0 }
  0xbb   :  { %v329_v38 = vadd.f32 %v328_v27, %v327_v33  ;;  %v342_v27 = vsel %vm142_vm0, %v2206_v9, 0.0  ;;  %v2226_v33 = vld [vmem:[%s4001_s0 + $0x330] sm:$0xff] }
  0xbc   :  { %4027 = vst [vmem:[#allocation12_spill] sm:$0xff] %v2226_v33  ;;  %v346_v44 = vsel %vm142_vm0, %v2226_v33, 0.0 }
  0xbd   :  { %v331_v45 = vadd.f32 %v330_v1, %v329_v38  ;;  %v672_v1 = vadd.f32 %v671_v20, %v670_v26  ;;  %v675_v38 = vsel %vm142_vm0, %v473_v18, 0.0  ;;  %v479_v18 = vmul.f32 %v2016_v21, %v2016_v21 }
  0xbe   :  { %v683_v20 = vsel %vm142_vm0, %v477_v54, 0.0  ;;  %v2306_v54 = vld [vmem:[%s4001_s0 + $0x370] sm:$0xff] }
  0xbf   :  { %v333_v53 = vadd.f32 %v332_v41, %v331_v45  ;;  %v674_v42 = vadd.f32 %v673_v32, %v672_v1  ;;  %v476_v45 = vmul.f32 %v1986_v8, %v1986_v8  ;;  %v480_v32 = vmul.f32 %v2026_v30, %v2026_v30  ;;  %v2286_v1 = vld [vmem:[%s4001_s0 + $0x360] sm:$0xff] }
  0xc1   :  { %v335_v60 = vadd.f32 %v334_v47, %v333_v53  ;;  %v2246_v47 = vld [vmem:[%s4001_s0 + $0x340] sm:$0xff]  ;;  %v676_v51 = vadd.f32 %v675_v38, %v674_v42  ;;  %v348_v53 = vsel %vm142_vm0, %v2236_v39, 0.0  ;;  %v681_v5 = vsel %vm142_vm0, %v476_v45, 0.0 }
  0xc2   :  { %v350_v62 = vsel %vm142_vm0, %v2246_v47, 0.0  ;;  %v687_v42 = vsel %vm142_vm0, %v479_v18, 0.0  ;;  %v484_v18 = vmul.f32 %v2066_v10, %v2066_v10 }
  0xc3   :  { %v337_v11 = vadd.f32 %v336_v56, %v335_v60  ;;  %v679_v56 = vsel %vm142_vm0, %v475_v36, 0.0  ;;  %v678_v60 = vadd.f32 %v677_v7, %v676_v51  ;;  %v482_v51 = vmul.f32 %v2046_v3, %v2046_v3 }
  0xc5   :  { %v339_v24 = vadd.f32 %v338_v63, %v337_v11  ;;  %v478_v63 = vmul.f32 %v2006_v17, %v2006_v17  ;;  %v680_v14 = vadd.f32 %v679_v56, %v678_v60 }
  0xc7   :  { %v341_v35 = vadd.f32 %v340_v15, %v339_v24  ;;  %v352_v15 = vsel %vm142_vm0, %v2256_v57, 0.0  ;;  %v2276_v24 = vld [vmem:[%s4001_s0 + $0x358] sm:$0xff] }
  0xc8   :  { %v356_v38 = vsel %vm142_vm0, %v2276_v24, 0.0 }
  0xc9   :  { %v343_v41 = vadd.f32 %v342_v27, %v341_v35  ;;  %v682_v27 = vadd.f32 %v681_v5, %v680_v14  ;;  %v685_v35 = vsel %vm142_vm0, %v478_v63, 0.0  ;;  %v2316_v5 = vld [vmem:[%s4001_s0 + $0x378] sm:$0xff] }
  0xcb   :  { %v345_v50 = vadd.f32 %v344_v2, %v343_v41  ;;  %v684_v36 = vadd.f32 %v683_v20, %v682_v27  ;;  %v481_v41 = vmul.f32 %v2036_v0, %v2036_v0  ;;  %v693_v20 = vsel %vm142_vm0, %v482_v51, 0.0 }
  0xcd   :  { %v347_v59 = vadd.f32 %v346_v44, %v345_v50  ;;  %v2296_v44 = vld [vmem:[%s4001_s0 + $0x368] sm:$0xff]  ;;  %v686_v7 = vadd.f32 %v685_v35, %v684_v36  ;;  %v358_v50 = vsel %vm142_vm0, %v2286_v1, 0.0  ;;  %v691_v63 = vsel %vm142_vm0, %v481_v41, 0.0 }
  0xce   :  { %v360_v60 = vsel %vm142_vm0, %v2296_v44, 0.0  ;;  %v485_v35 = vmul.f32 %v2076_v13, %v2076_v13  ;;  %v2336_v36 = vld [vmem:[%s4001_s0 + $0x388] sm:$0xff] }
  0xcf   :  { %v349_v11 = vadd.f32 %v348_v53, %v347_v59  ;;  %v689_v53 = vsel %vm142_vm0, %v480_v32, 0.0  ;;  %v688_v59 = vadd.f32 %v687_v42, %v686_v7  ;;  %v364_v32 = vsel %vm142_vm0, %v2316_v5, 0.0 }
  0xd0   :  { %v697_v7 = vsel %vm142_vm0, %v484_v18, 0.0 }
  0xd1   :  { %v351_v26 = vadd.f32 %v350_v62, %v349_v11  ;;  %v483_v62 = vmul.f32 %v2056_v48, %v2056_v48  ;;  %v690_v14 = vadd.f32 %v689_v53, %v688_v59  ;;  %v487_v59 = vmul.f32 %v2096_v19, %v2096_v19 }
  0xd3   :  { %v353_v2 = vadd.f32 %v352_v15, %v351_v26  ;;  %v362_v15 = vsel %vm142_vm0, %v2306_v54, 0.0  ;;  %v2326_v26 = vld [vmem:[%s4001_s0 + $0x380] sm:$0xff] }
  0xd4   :  { %v366_v42 = vsel %vm142_vm0, %v2326_v26, 0.0 }
  0xd5   :  { %v355_v45 = vadd.f32 %v354_v29, %v353_v2  ;;  %v692_v29 = vadd.f32 %v691_v63, %v690_v14  ;;  %v695_v2 = vsel %vm142_vm0, %v483_v62, 0.0  ;;  %v2356_v62 = vld [vmem:[%s4001_s0 + $0x398] sm:$0xff] }
  0xd7   :  { %v357_v56 = vadd.f32 %v356_v38, %v355_v45  ;;  %v694_v41 = vadd.f32 %v693_v20, %v692_v29  ;;  %v486_v45 = vmul.f32 %v2086_v16, %v2086_v16  ;;  %v2366_v20 = vld [vmem:[%s4001_s0 + $0x3a0] sm:$0xff] }
  0xd9   :  { %v359_v11 = vadd.f32 %v358_v50, %v357_v56  ;;  %v2346_v50 = vld [vmem:[%s4001_s0 + $0x390] sm:$0xff]  ;;  %v696_v53 = vadd.f32 %v695_v2, %v694_v41  ;;  %v368_v56 = vsel %vm142_vm0, %v2336_v36, 0.0  ;;  %v701_v18 = vsel %vm142_vm0, %v486_v45, 0.0 }
  0xda   :  { %v370_v14 = vsel %vm142_vm0, %v2346_v50, 0.0  ;;  %v703_v2 = vsel %vm142_vm0, %v487_v59, 0.0  ;;  %v374_v45 = vsel %vm142_vm0, %v2366_v20, 0.0 }
  0xdb   :  { %v361_v27 = vadd.f32 %v360_v60, %v359_v11  ;;  %v699_v60 = vsel %vm142_vm0, %v485_v35, 0.0  ;;  %v698_v11 = vadd.f32 %v697_v7, %v696_v53  ;;  %v489_v35 = vmul.f32 %v2116_v25, %v2116_v25  ;;  %v2386_v53 = vld [vmem:[%s4001_s0 + $0x3b0] sm:$0xff] }
  0xdc   :  { %v490_v7 = vmul.f32 %v2126_v28, %v2126_v28 }
  0xdd   :  { %v363_v38 = vadd.f32 %v362_v15, %v361_v27  ;;  %v488_v15 = vmul.f32 %v2106_v22, %v2106_v22  ;;  %v700_v29 = vadd.f32 %v699_v60, %v698_v11  ;;  %v707_v11 = vsel %vm142_vm0, %v489_v35, 0.0 }
  0xdf   :  { %v365_v51 = vadd.f32 %v364_v32, %v363_v38  ;;  %v372_v32 = vsel %vm142_vm0, %v2356_v62, 0.0  ;;  %v2376_v38 = vld [vmem:[%s4001_s0 + $0x3a8] sm:$0xff] }
  0xe0   :  { %v376_v60 = vsel %vm142_vm0, %v2376_v38, 0.0 }
  0xe1   :  { %v367_v63 = vadd.f32 %v366_v42, %v365_v51  ;;  %v702_v42 = vadd.f32 %v701_v18, %v700_v29  ;;  %v705_v51 = vsel %vm142_vm0, %v488_v15, 0.0  ;;  %v492_v29 = vmul.f32 %v2146_v34, %v2146_v34 }
  0xe3   :  { %v369_v27 = vadd.f32 %v368_v56, %v367_v63  ;;  %v704_v59 = vadd.f32 %v703_v2, %v702_v42  ;;  %v491_v63 = vmul.f32 %v2136_v31, %v2136_v31  ;;  %v2406_v2 = vld [vmem:[%s4001_s0 + $0x3c0] sm:$0xff] }
  0xe4   :  { %v382_v34 = vsel %vm142_vm0, %v2406_v2, 0.0 }
  0xe5   :  { %v371_v41 = vadd.f32 %v370_v14, %v369_v27  ;;  %v2396_v14 = vld [vmem:[%s4001_s0 + $0x3b8] sm:$0xff]  ;;  %v706_v18 = vadd.f32 %v705_v51, %v704_v59  ;;  %v378_v27 = vsel %vm142_vm0, %v2386_v53, 0.0  ;;  %v711_v51 = vsel %vm142_vm0, %v491_v63, 0.0 }
  0xe6   :  { %v380_v42 = vsel %vm142_vm0, %v2396_v14, 0.0 }
  0xe7   :  { %v373_v56 = vadd.f32 %v372_v32, %v371_v41  ;;  %v709_v32 = vsel %vm142_vm0, %v490_v7, 0.0  ;;  %v708_v41 = vadd.f32 %v707_v11, %v706_v18  ;;  %v713_v11 = vsel %vm142_vm0, %v492_v29, 0.0 }
  0xe9   :  { %v375_v15 = vadd.f32 %v374_v45, %v373_v56  ;;  %v493_v45 = vmul.f32 %v2156_v37, %v2156_v37  ;;  %v2416_v56 = vld [vmem:[%s4001_s0 + $0x3c8] sm:$0xff]  ;;  %v710_v59 = vadd.f32 %v709_v32, %v708_v41 }
  0xea   :  { %v384_v37 = vsel %vm142_vm0, %v2416_v56, 0.0 }
  0xeb   :  { %v377_v35 = vadd.f32 %v376_v60, %v375_v15  ;;  %v494_v60 = vmul.f32 %v2166_v40, %v2166_v40  ;;  %v2426_v15 = vld [vmem:[%s4001_s0 + $0x3d0] sm:$0xff]  ;;  %v712_v18 = vadd.f32 %v711_v51, %v710_v59  ;;  %v715_v32 = vsel %vm142_vm0, %v493_v45, 0.0 }
  0xec   :  { %v386_v40 = vsel %vm142_vm0, %v2426_v15, 0.0 }
  0xed   :  { %v379_v7 = vadd.f32 %v378_v27, %v377_v35  ;;  %v495_v27 = vmul.f32 %v2176_v43, %v2176_v43  ;;  %v2436_v35 = vld [vmem:[%s4001_s0 + $0x3d8] sm:$0xff]  ;;  %v714_v41 = vadd.f32 %v713_v11, %v712_v18  ;;  %v717_v51 = vsel %vm142_vm0, %v494_v60, 0.0 }
  0xee   :  { %v388_v43 = vsel %vm142_vm0, %v2436_v35, 0.0 }
  0xef   :  { %v381_v63 = vadd.f32 %v380_v42, %v379_v7  ;;  %v496_v42 = vmul.f32 %v2186_v46, %v2186_v46  ;;  %v2446_v7 = vld [vmem:[%s4001_s0 + $0x3e0] sm:$0xff]  ;;  %v716_v59 = vadd.f32 %v715_v32, %v714_v41  ;;  %v719_v11 = vsel %vm142_vm0, %v495_v27, 0.0 }
  0xf0   :  { %v390_v46 = vsel %vm142_vm0, %v2446_v7, 0.0 }
  0xf1   :  { %v383_v29 = vadd.f32 %v382_v34, %v381_v63  ;;  %v497_v34 = vmul.f32 %v2196_v49, %v2196_v49  ;;  %v2456_v63 = vld [vmem:[%s4001_s0 + $0x3e8] sm:$0xff]  ;;  %v718_v18 = vadd.f32 %v717_v51, %v716_v59  ;;  %v721_v32 = vsel %vm142_vm0, %v496_v42, 0.0 }
  0xf2   :  { %v392_v49 = vsel %vm142_vm0, %v2456_v63, 0.0 }
  0xf3   :  { %v385_v45 = vadd.f32 %v384_v37, %v383_v29  ;;  %v498_v37 = vmul.f32 %v2206_v9, %v2206_v9  ;;  %v2466_v29 = vld [vmem:[%s4001_s0 + $0x3f0] sm:$0xff]  ;;  %v720_v41 = vadd.f32 %v719_v11, %v718_v18  ;;  %v723_v51 = vsel %vm142_vm0, %v497_v34, 0.0 }
  0xf4   :  { %v394_v9 = vsel %vm142_vm0, %v2466_v29, 0.0 }
  0xf5   :  { %v387_v60 = vadd.f32 %v386_v40, %v385_v45  ;;  %v499_v40 = vmul.f32 %v2216_v23, %v2216_v23  ;;  %v2476_v45 = vld [vmem:[%s4001_s0 + $0x3f8] sm:$0xff]  ;;  %v722_v59 = vadd.f32 %v721_v32, %v720_v41  ;;  %v725_v11 = vsel %vm142_vm0, %v498_v37, 0.0 }
  0xf6   :  { %4028 = vst [vmem:[#allocation13_spill] sm:$0xff] %v2476_v45  ;;  %v396_v34 = vsel %vm142_vm0, %v2476_v45, 0.0  ;;  %v501_v23 = vmul.f32 %v2236_v39, %v2236_v39 }
  0xf7   :  { %v389_v27 = vadd.f32 %v388_v43, %v387_v60  ;;  %v500_v43 = vmul.f32 %v2226_v33, %v2226_v33  ;;  %v724_v18 = vadd.f32 %v723_v51, %v722_v59  ;;  %v727_v31 = vsel %vm142_vm0, %v499_v40, 0.0 }
  0xf8   :  { %v731_v37 = vsel %vm142_vm0, %v501_v23, 0.0 }
  0xf9   :  { %v391_v42 = vadd.f32 %v390_v46, %v389_v27  ;;  %v726_v32 = vadd.f32 %v725_v11, %v724_v18  ;;  %v502_v27 = vmul.f32 %v2246_v47, %v2246_v47  ;;  %v729_v41 = vsel %vm142_vm0, %v500_v43, 0.0 }
  0xfa   :  { %v505_v43 = vmul.f32 %v2276_v24, %v2276_v24 }
  0xfb   :  { %v393_v60 = vadd.f32 %v392_v49, %v391_v42  ;;  %v728_v28 = vadd.f32 %v727_v31, %v726_v32  ;;  %v503_v49 = vmul.f32 %v2256_v57, %v2256_v57  ;;  %v733_v40 = vsel %vm142_vm0, %v502_v27, 0.0 }
  0xfc   :  { %v739_v18 = vsel %vm142_vm0, %v505_v43, 0.0 }
  0xfd   :  { %v395_v46 = vadd.f32 %v394_v9, %v393_v60  ;;  %v730_v42 = vadd.f32 %v729_v41, %v728_v28  ;;  %v504_v9 = vmul.f32 %v2266_v6, %v2266_v6  ;;  %v735_v31 = vsel %vm142_vm0, %v503_v49, 0.0 }
  0xfe   :  { %v506_v60 = vmul.f32 %v2286_v1, %v2286_v1  ;;  %v507_v28 = vmul.f32 %v2296_v44, %v2296_v44  ;;  %v509_v41 = vmul.f32 %v2316_v5, %v2316_v5 }
  0xff   :  { %v397_v33 = vadd.f32 %v396_v34, %v395_v46  ;;  %v732_v59 = vadd.f32 %v731_v37, %v730_v42  ;;  %v737_v23 = vsel %vm142_vm0, %v504_v9, 0.0  ;;  %v508_v46 = vmul.f32 %v2306_v54, %v2306_v54 }
 0x100   :  { %v741_v32 = vsel %vm142_vm0, %v506_v60, 0.0  ;;  %v743_v49 = vsel %vm142_vm0, %v507_v28, 0.0 }
 0x101   :  { %v781_v51 = vsel %vm142_vm0, %v397_v33, 0.0  ;;  %v734_v11 = vadd.f32 %v733_v40, %v732_v59  ;;  %v745_v42 = vsel %vm142_vm0, %v508_v46, 0.0  ;;  %v511_v40 = vmul.f32 %v2336_v36, %v2336_v36 }
 0x102   :  { %782 = vadd.xlane.f32.xlu0 %v781_v51  ;;  %v510_v51 = vmul.f32 %v2326_v26, %v2326_v26  ;;  %v747_v59 = vsel %vm142_vm0, %v509_v41, 0.0 }
 0x103   :  { %v736_v33 = vadd.f32 %v735_v31, %v734_v11  ;;  %v512_v31 = vmul.f32 %v2346_v50, %v2346_v50 }
 0x104   :  { %v749_v11 = vsel %vm142_vm0, %v510_v51, 0.0 }
 0x105   :  { %v738_v34 = vadd.f32 %v737_v23, %v736_v33  ;;  %v513_v23 = vmul.f32 %v2356_v62, %v2356_v62  ;;  %v751_v33 = vsel %vm142_vm0, %v511_v40, 0.0 }
 0x107   :  { %v740_v27 = vadd.f32 %v739_v18, %v738_v34  ;;  %v514_v18 = vmul.f32 %v2366_v20, %v2366_v20  ;;  %v753_v34 = vsel %vm142_vm0, %v512_v31, 0.0 }
 0x109   :  { %v742_v37 = vadd.f32 %v741_v32, %v740_v27  ;;  %v515_v32 = vmul.f32 %v2376_v38, %v2376_v38  ;;  %v755_v27 = vsel %vm142_vm0, %v513_v23, 0.0 }
 0x10b   :  { %v744_v9 = vadd.f32 %v743_v49, %v742_v37  ;;  %v516_v49 = vmul.f32 %v2386_v53, %v2386_v53  ;;  %v757_v37 = vsel %vm142_vm0, %v514_v18, 0.0 }
 0x10d   :  { %v746_v43 = vadd.f32 %v745_v42, %v744_v9  ;;  %v517_v42 = vmul.f32 %v2396_v14, %v2396_v14  ;;  %v759_v9 = vsel %vm142_vm0, %v515_v32, 0.0 }
 0x10f   :  { %v748_v60 = vadd.f32 %v747_v59, %v746_v43  ;;  %v518_v59 = vmul.f32 %v2406_v2, %v2406_v2  ;;  %v761_v43 = vsel %vm142_vm0, %v516_v49, 0.0 }
 0x111   :  { %v750_v28 = vadd.f32 %v749_v11, %v748_v60  ;;  %v519_v11 = vmul.f32 %v2416_v56, %v2416_v56  ;;  %v763_v60 = vsel %vm142_vm0, %v517_v42, 0.0 }
 0x113   :  { %v752_v46 = vadd.f32 %v751_v33, %v750_v28  ;;  %v520_v33 = vmul.f32 %v2426_v15, %v2426_v15  ;;  %v765_v28 = vsel %vm142_vm0, %v518_v59, 0.0 }
 0x115   :  { %v754_v41 = vadd.f32 %v753_v34, %v752_v46  ;;  %v521_v34 = vmul.f32 %v2436_v35, %v2436_v35  ;;  %v767_v46 = vsel %vm142_vm0, %v519_v11, 0.0 }
 0x117   :  { %v756_v51 = vadd.f32 %v755_v27, %v754_v41  ;;  %v522_v27 = vmul.f32 %v2446_v7, %v2446_v7  ;;  %v769_v41 = vsel %vm142_vm0, %v520_v33, 0.0 }
 0x119   :  { %v758_v40 = vadd.f32 %v757_v37, %v756_v51  ;;  %v523_v37 = vmul.f32 %v2456_v63, %v2456_v63  ;;  %v771_v51 = vsel %vm142_vm0, %v521_v34, 0.0 }
 0x11b   :  { %v760_v31 = vadd.f32 %v759_v9, %v758_v40  ;;  %v524_v9 = vmul.f32 %v2466_v29, %v2466_v29  ;;  %v773_v40 = vsel %vm142_vm0, %v522_v27, 0.0 }
 0x11d   :  { %v762_v23 = vadd.f32 %v761_v43, %v760_v31  ;;  %v525_v43 = vmul.f32 %v2476_v45, %v2476_v45  ;;  %v775_v31 = vsel %vm142_vm0, %v523_v37, 0.0  ;;  %v794_v37 = vld [vmem:[%s4002_s1] sm:$0xff] }
 0x11f   :  { %v764_v18 = vadd.f32 %v763_v60, %v762_v23  ;;  %v777_v60 = vsel %vm142_vm0, %v524_v9, 0.0  ;;  %v779_v33 = vsel %vm142_vm0, %v525_v43, 0.0 }
 0x121   :  { %v766_v32 = vadd.f32 %v765_v28, %v764_v18 }
 0x123   :  { %v768_v49 = vadd.f32 %v767_v46, %v766_v32 }
 0x125   :  { %v770_v42 = vadd.f32 %v769_v41, %v768_v49 }
 0x127   :  { %v772_v59 = vadd.f32 %v771_v51, %v770_v42 }
 0x129   :  { %v774_v11 = vadd.f32 %v773_v40, %v772_v59  ;;  %v796_v59 = vld [vmem:[%s4003_s2] sm:$0xff] }
 0x12b   :  { %v776_v23 = vadd.f32 %v775_v31, %v774_v11  ;;  %v1189_v31 = vld [vmem:[%s4001_s0] sm:$0xff] }
 0x12d   :  { %v778_v28 = vadd.f32 %v777_v60, %v776_v23  ;;  %v1191_v23 = vld [vmem:[%s4001_s0 + $0x10] sm:$0xff] }
 0x12f   :  { %v780_v18 = vadd.f32 %v779_v33, %v778_v28  ;;  %v1192_v28 = vld [vmem:[%s4001_s0 + $0x18] sm:$0xff] }
 0x131   :  { %v784_v34 = vsel %vm142_vm0, %v780_v18, 0.0 }
 0x132   :  { %785 = vadd.xlane.f32.xlu0 %v784_v34  ;;  %v1193_v34 = vld [vmem:[%s4001_s0 + $0x20] sm:$0xff] }
 0x18b   :  { %v783_v46 = vpop.xlane.xlu0 %782 }
 0x18c   :  { %v787_v32 = vmul.f32 0.0009765625, %v783_v46 }
 0x18e   :  { %v789_v49 = vmul.f32 %v787_v32, %v787_v32 }
 0x1bb   :  { %v786_v27 = vpop.xlane.xlu0 %785 }
 0x1bc   :  { %v788_v41 = vmul.f32 0.0009765625, %v786_v27 }
 0x1be   :  { %v790_v51 = vsub.f32 %v788_v41, %v789_v49  ;;  %v1195_v41 = vld [vmem:[%s4001_s0 + $0x30] sm:$0xff] }
 0x1c0   :  { %v791_v42 = vmax.f32 %v790_v51, 0.0 }
 0x1c2   :  { %v792_v45 = vadd.f32 1e-05, %v791_v42  ;;  %v1196_v42 = vld [vmem:[%s4001_s0 + $0x38] sm:$0xff] }
 0x1c4   :  { %1187 = vrsqrt.f32 %v792_v45  ;;  %v1190_v45 = vld [vmem:[%s4001_s0 + $0x8] sm:$0xff] }
 0x1d1   :  { %v1188_v9 = vpop.eup %1187 }
 0x1d2   :  { %v2567_v40 = vmul.f32 %v1188_v9, %v794_v37  ;;  %v1197_v9 = vld [vmem:[%s4001_s0 + $0x40] sm:$0xff] }
 0x1d4   :  { %v797_v43 = vmul.f32 %v2567_v40, %v787_v32  ;;  %v2577_v11 = vmul.f32 %v1189_v31, %v2567_v40  ;;  %v2583_v60 = vmul.f32 %v1190_v45, %v2567_v40  ;;  %v2589_v33 = vmul.f32 %v1191_v23, %v2567_v40  ;;  %v1194_v32 = vld [vmem:[%s4001_s0 + $0x28] sm:$0xff] }
 0x1d5   :  { %v2595_v18 = vmul.f32 %v1192_v28, %v2567_v40  ;;  %v2601_v46 = vmul.f32 %v1193_v34, %v2567_v40  ;;  %v2607_v27 = vmul.f32 %v1194_v32, %v2567_v40  ;;  %v2613_v49 = vmul.f32 %v1195_v41, %v2567_v40  ;;  %v1198_v45 = vld [vmem:[%s4001_s0 + $0x48] sm:$0xff]  ;;  %v1200_v28 = vld [vmem:[%s4001_s0 + $0x58] sm:$0xff]  ;;  %v1201_v32 = vld [vmem:[%s4001_s0 + $0x60] sm:$0xff] }
 0x1d6   :  { %v2615_v51 = vsub.f32 %v796_v59, %v797_v43  ;;  %v2621_v37 = vmul.f32 %v1196_v42, %v2567_v40  ;;  %v2627_v31 = vmul.f32 %v1197_v9, %v2567_v40  ;;  %v2633_v59 = vmul.f32 %v1198_v45, %v2567_v40  ;;  %v1199_v43 = vld [vmem:[%s4001_s0 + $0x50] sm:$0xff]  ;;  %v1202_v42 = vld [vmem:[%s4001_s0 + $0x68] sm:$0xff] }
 0x1d7   :  { %v2639_v23 = vmul.f32 %v1199_v43, %v2567_v40  ;;  %v2645_v34 = vmul.f32 %v1200_v28, %v2567_v40  ;;  %v2651_v41 = vmul.f32 %v1201_v32, %v2567_v40  ;;  %v2657_v9 = vmul.f32 %v1202_v42, %v2567_v40  ;;  %v1203_v45 = vld [vmem:[%s4001_s0 + $0x70] sm:$0xff]  ;;  %v1204_v28 = vld [vmem:[%s4001_s0 + $0x78] sm:$0xff] }
 0x1d8   :  { %v2663_v43 = vmul.f32 %v1203_v45, %v2567_v40  ;;  %v2669_v32 = vmul.f32 %v1204_v28, %v2567_v40 }
 0x1d9   :  { %4029 = vst [vmem:[#allocation14_spill] sm:$0xff] %v2651_v41  ;;  %4030 = vst [vmem:[#allocation15_spill] sm:$0xff] %v2657_v9  ;;  %v1205_v41 = vld [vmem:[%s4001_s0 + $0x80] sm:$0xff]  ;;  %v1206_v9 = vld [vmem:[%s4001_s0 + $0x88] sm:$0xff] }
 0x1da   :  { %4031 = vst [vmem:[#allocation16_spill] sm:$0xff] %v2663_v43  ;;  %4032 = vst [vmem:[#allocation17_spill] sm:$0xff] %v2669_v32  ;;  %v2675_v42 = vmul.f32 %v1205_v41, %v2567_v40  ;;  %v2681_v45 = vmul.f32 %v1206_v9, %v2567_v40  ;;  %v1207_v43 = vld [vmem:[%s4001_s0 + $0x90] sm:$0xff]  ;;  %v1208_v32 = vld [vmem:[%s4001_s0 + $0x98] sm:$0xff] }
 0x1db   :  { %v2687_v28 = vmul.f32 %v1207_v43, %v2567_v40  ;;  %v2693_v41 = vmul.f32 %v1208_v32, %v2567_v40 }
 0x1dc   :  { %4033 = vst [vmem:[#allocation18_spill] sm:$0xff] %v2675_v42  ;;  %4034 = vst [vmem:[#allocation19_spill] sm:$0xff] %v2681_v45  ;;  %v1209_v42 = vld [vmem:[%s4001_s0 + $0xa0] sm:$0xff]  ;;  %v1210_v45 = vld [vmem:[%s4001_s0 + $0xa8] sm:$0xff] }
 0x1dd   :  { %4035 = vst [vmem:[#allocation20_spill] sm:$0xff] %v2687_v28  ;;  %4036 = vst [vmem:[#allocation21_spill] sm:$0xff] %v2693_v41  ;;  %v2699_v9 = vmul.f32 %v1209_v42, %v2567_v40  ;;  %v2705_v43 = vmul.f32 %v1210_v45, %v2567_v40  ;;  %v1211_v28 = vld [vmem:[%s4001_s0 + $0xb0] sm:$0xff]  ;;  %v1212_v41 = vld [vmem:[%s4001_s0 + $0xb8] sm:$0xff] }
 0x1de   :  { %v2711_v32 = vmul.f32 %v1211_v28, %v2567_v40  ;;  %v2717_v42 = vmul.f32 %v1212_v41, %v2567_v40 }
 0x1df   :  { %4037 = vst [vmem:[#allocation22_spill] sm:$0xff] %v2699_v9  ;;  %4038 = vst [vmem:[#allocation23_spill] sm:$0xff] %v2705_v43  ;;  %v1213_v9 = vld [vmem:[%s4001_s0 + $0xc0] sm:$0xff]  ;;  %v1214_v43 = vld [vmem:[%s4001_s0 + $0xc8] sm:$0xff] }
 0x1e0   :  { %4039 = vst [vmem:[#allocation24_spill] sm:$0xff] %v2711_v32  ;;  %4040 = vst [vmem:[#allocation25_spill] sm:$0xff] %v2717_v42  ;;  %v2723_v45 = vmul.f32 %v1213_v9, %v2567_v40  ;;  %v2729_v28 = vmul.f32 %v1214_v43, %v2567_v40  ;;  %v1215_v32 = vld [vmem:[%s4001_s0 + $0xd0] sm:$0xff]  ;;  %v1216_v42 = vld [vmem:[%s4001_s0 + $0xd8] sm:$0xff] }
 0x1e1   :  { %v2735_v41 = vmul.f32 %v1215_v32, %v2567_v40  ;;  %v2741_v9 = vmul.f32 %v1216_v42, %v2567_v40 }
 0x1e2   :  { %4041 = vst [vmem:[#allocation26_spill] sm:$0xff] %v2723_v45  ;;  %4042 = vst [vmem:[#allocation27_spill] sm:$0xff] %v2729_v28  ;;  %v1217_v45 = vld [vmem:[%s4001_s0 + $0xe0] sm:$0xff]  ;;  %v1218_v28 = vld [vmem:[%s4001_s0 + $0xe8] sm:$0xff] }
 0x1e3   :  { %4043 = vst [vmem:[#allocation28_spill] sm:$0xff] %v2735_v41  ;;  %4044 = vst [vmem:[#allocation29_spill] sm:$0xff] %v2741_v9  ;;  %v2747_v43 = vmul.f32 %v1217_v45, %v2567_v40  ;;  %v2753_v32 = vmul.f32 %v1218_v28, %v2567_v40  ;;  %v1219_v41 = vld [vmem:[%s4001_s0 + $0xf0] sm:$0xff]  ;;  %v1220_v9 = vld [vmem:[%s4001_s0 + $0xf8] sm:$0xff] }
 0x1e4   :  { %v2759_v42 = vmul.f32 %v1219_v41, %v2567_v40  ;;  %v2765_v45 = vmul.f32 %v1220_v9, %v2567_v40 }
 0x1e5   :  { %4045 = vst [vmem:[#allocation30_spill] sm:$0xff] %v2747_v43  ;;  %4046 = vst [vmem:[#allocation31_spill] sm:$0xff] %v2753_v32  ;;  %v1221_v43 = vld [vmem:[%s4001_s0 + $0x100] sm:$0xff]  ;;  %v1222_v32 = vld [vmem:[%s4001_s0 + $0x108] sm:$0xff] }
 0x1e6   :  { %4047 = vst [vmem:[#allocation32_spill] sm:$0xff] %v2759_v42  ;;  %4048 = vst [vmem:[#allocation33_spill] sm:$0xff] %v2765_v45  ;;  %v2771_v28 = vmul.f32 %v1221_v43, %v2567_v40  ;;  %v2777_v41 = vmul.f32 %v1222_v32, %v2567_v40  ;;  %v1223_v42 = vld [vmem:[%s4001_s0 + $0x110] sm:$0xff]  ;;  %v1224_v45 = vld [vmem:[%s4001_s0 + $0x118] sm:$0xff] }
 0x1e7   :  { %v2783_v9 = vmul.f32 %v1223_v42, %v2567_v40  ;;  %v2789_v43 = vmul.f32 %v1224_v45, %v2567_v40 }
 0x1e8   :  { %4049 = vst [vmem:[#allocation34_spill] sm:$0xff] %v2771_v28  ;;  %4050 = vst [vmem:[#allocation35_spill] sm:$0xff] %v2777_v41  ;;  %v1225_v28 = vld [vmem:[%s4001_s0 + $0x120] sm:$0xff]  ;;  %v1226_v41 = vld [vmem:[%s4001_s0 + $0x128] sm:$0xff] }
 0x1e9   :  { %4051 = vst [vmem:[#allocation36_spill] sm:$0xff] %v2783_v9  ;;  %4052 = vst [vmem:[#allocation37_spill] sm:$0xff] %v2789_v43  ;;  %v2795_v32 = vmul.f32 %v1225_v28, %v2567_v40  ;;  %v2801_v42 = vmul.f32 %v1226_v41, %v2567_v40  ;;  %v1227_v9 = vld [vmem:[%s4001_s0 + $0x130] sm:$0xff]  ;;  %v1228_v43 = vld [vmem:[%s4001_s0 + $0x138] sm:$0xff] }
 0x1ea   :  { %v2807_v45 = vmul.f32 %v1227_v9, %v2567_v40  ;;  %v2813_v28 = vmul.f32 %v1228_v43, %v2567_v40 }
 0x1eb   :  { %4053 = vst [vmem:[#allocation38_spill] sm:$0xff] %v2795_v32  ;;  %4054 = vst [vmem:[#allocation39_spill] sm:$0xff] %v2801_v42  ;;  %v1229_v32 = vld [vmem:[%s4001_s0 + $0x140] sm:$0xff]  ;;  %v1230_v42 = vld [vmem:[%s4001_s0 + $0x148] sm:$0xff] }
 0x1ec   :  { %4055 = vst [vmem:[#allocation40_spill] sm:$0xff] %v2807_v45  ;;  %4056 = vst [vmem:[#allocation41_spill] sm:$0xff] %v2813_v28  ;;  %v2819_v41 = vmul.f32 %v1229_v32, %v2567_v40  ;;  %v2825_v9 = vmul.f32 %v1230_v42, %v2567_v40  ;;  %v1231_v45 = vld [vmem:[%s4001_s0 + $0x150] sm:$0xff]  ;;  %v1232_v28 = vld [vmem:[%s4001_s0 + $0x158] sm:$0xff] }
 0x1ed   :  { %v2831_v43 = vmul.f32 %v1231_v45, %v2567_v40  ;;  %v2837_v32 = vmul.f32 %v1232_v28, %v2567_v40 }
 0x1ee   :  { %4057 = vst [vmem:[#allocation42_spill] sm:$0xff] %v2819_v41  ;;  %4058 = vst [vmem:[#allocation43_spill] sm:$0xff] %v2825_v9  ;;  %v1233_v41 = vld [vmem:[%s4001_s0 + $0x160] sm:$0xff]  ;;  %v1234_v9 = vld [vmem:[%s4001_s0 + $0x168] sm:$0xff] }
 0x1ef   :  { %4059 = vst [vmem:[#allocation44_spill] sm:$0xff] %v2831_v43  ;;  %4060 = vst [vmem:[#allocation45_spill] sm:$0xff] %v2837_v32  ;;  %v2843_v42 = vmul.f32 %v1233_v41, %v2567_v40  ;;  %v2849_v45 = vmul.f32 %v1234_v9, %v2567_v40  ;;  %v1235_v43 = vld [vmem:[%s4001_s0 + $0x170] sm:$0xff]  ;;  %v1236_v32 = vld [vmem:[%s4001_s0 + $0x178] sm:$0xff] }
 0x1f0   :  { %v2855_v28 = vmul.f32 %v1235_v43, %v2567_v40  ;;  %v2861_v41 = vmul.f32 %v1236_v32, %v2567_v40 }
 0x1f1   :  { %4061 = vst [vmem:[#allocation46_spill] sm:$0xff] %v2843_v42  ;;  %4062 = vst [vmem:[#allocation47_spill] sm:$0xff] %v2849_v45  ;;  %v1237_v42 = vld [vmem:[%s4001_s0 + $0x180] sm:$0xff]  ;;  %v1238_v45 = vld [vmem:[%s4001_s0 + $0x188] sm:$0xff] }
 0x1f2   :  { %4063 = vst [vmem:[#allocation48_spill] sm:$0xff] %v2855_v28  ;;  %4064 = vst [vmem:[#allocation49_spill] sm:$0xff] %v2861_v41  ;;  %v2867_v9 = vmul.f32 %v1237_v42, %v2567_v40  ;;  %v2873_v43 = vmul.f32 %v1238_v45, %v2567_v40  ;;  %v1239_v28 = vld [vmem:[%s4001_s0 + $0x190] sm:$0xff]  ;;  %v1240_v41 = vld [vmem:[%s4001_s0 + $0x198] sm:$0xff] }
 0x1f3   :  { %v2879_v32 = vmul.f32 %v1239_v28, %v2567_v40  ;;  %v2885_v42 = vmul.f32 %v1240_v41, %v2567_v40 }
 0x1f4   :  { %4065 = vst [vmem:[#allocation50_spill] sm:$0xff] %v2867_v9  ;;  %4066 = vst [vmem:[#allocation51_spill] sm:$0xff] %v2873_v43  ;;  %v1241_v9 = vld [vmem:[%s4001_s0 + $0x1a0] sm:$0xff]  ;;  %v1242_v43 = vld [vmem:[%s4001_s0 + $0x1a8] sm:$0xff] }
 0x1f5   :  { %4067 = vst [vmem:[#allocation52_spill] sm:$0xff] %v2879_v32  ;;  %4068 = vst [vmem:[#allocation53_spill] sm:$0xff] %v2885_v42  ;;  %v2891_v45 = vmul.f32 %v1241_v9, %v2567_v40  ;;  %v2897_v28 = vmul.f32 %v1242_v43, %v2567_v40  ;;  %v1243_v32 = vld [vmem:[%s4001_s0 + $0x1b0] sm:$0xff]  ;;  %v1244_v42 = vld [vmem:[%s4001_s0 + $0x1b8] sm:$0xff] }
 0x1f6   :  { %v2903_v41 = vmul.f32 %v1243_v32, %v2567_v40  ;;  %v2909_v9 = vmul.f32 %v1244_v42, %v2567_v40 }
 0x1f7   :  { %4069 = vst [vmem:[#allocation54_spill] sm:$0xff] %v2891_v45  ;;  %4070 = vst [vmem:[#allocation55_spill] sm:$0xff] %v2897_v28  ;;  %v1245_v45 = vld [vmem:[%s4001_s0 + $0x1c0] sm:$0xff]  ;;  %v1246_v28 = vld [vmem:[%s4001_s0 + $0x1c8] sm:$0xff] }
 0x1f8   :  { %4071 = vst [vmem:[#allocation56_spill] sm:$0xff] %v2903_v41  ;;  %4072 = vst [vmem:[#allocation57_spill] sm:$0xff] %v2909_v9  ;;  %v2915_v43 = vmul.f32 %v1245_v45, %v2567_v40  ;;  %v2921_v32 = vmul.f32 %v1246_v28, %v2567_v40  ;;  %v1247_v41 = vld [vmem:[%s4001_s0 + $0x1d0] sm:$0xff]  ;;  %v1248_v9 = vld [vmem:[%s4001_s0 + $0x1d8] sm:$0xff] }
 0x1f9   :  { %v2927_v42 = vmul.f32 %v1247_v41, %v2567_v40  ;;  %v2933_v45 = vmul.f32 %v1248_v9, %v2567_v40 }
 0x1fa   :  { %4073 = vst [vmem:[#allocation58_spill] sm:$0xff] %v2915_v43  ;;  %4074 = vst [vmem:[#allocation59_spill] sm:$0xff] %v2921_v32  ;;  %v1249_v43 = vld [vmem:[%s4001_s0 + $0x1e0] sm:$0xff]  ;;  %v1250_v32 = vld [vmem:[%s4001_s0 + $0x1e8] sm:$0xff] }
 0x1fb   :  { %4075 = vst [vmem:[#allocation60_spill] sm:$0xff] %v2927_v42  ;;  %4076 = vst [vmem:[#allocation61_spill] sm:$0xff] %v2933_v45  ;;  %v2939_v28 = vmul.f32 %v1249_v43, %v2567_v40  ;;  %v2945_v41 = vmul.f32 %v1250_v32, %v2567_v40  ;;  %v1251_v42 = vld [vmem:[%s4001_s0 + $0x1f0] sm:$0xff]  ;;  %v1252_v45 = vld [vmem:[%s4001_s0 + $0x1f8] sm:$0xff] }
 0x1fc   :  { %v2951_v9 = vmul.f32 %v1251_v42, %v2567_v40  ;;  %v2957_v43 = vmul.f32 %v1252_v45, %v2567_v40 }
 0x1fd   :  { %4077 = vst [vmem:[#allocation62_spill] sm:$0xff] %v2939_v28  ;;  %4078 = vst [vmem:[#allocation63_spill] sm:$0xff] %v2945_v41  ;;  %v1253_v28 = vld [vmem:[%s4001_s0 + $0x200] sm:$0xff]  ;;  %v1254_v41 = vld [vmem:[%s4001_s0 + $0x208] sm:$0xff] }
 0x1fe   :  { %4079 = vst [vmem:[#allocation64_spill] sm:$0xff] %v2951_v9  ;;  %4080 = vst [vmem:[#allocation65_spill] sm:$0xff] %v2957_v43  ;;  %v2963_v32 = vmul.f32 %v1253_v28, %v2567_v40  ;;  %v2969_v42 = vmul.f32 %v1254_v41, %v2567_v40  ;;  %v1255_v9 = vld [vmem:[%s4001_s0 + $0x210] sm:$0xff]  ;;  %v1256_v43 = vld [vmem:[%s4001_s0 + $0x218] sm:$0xff] }
 0x1ff   :  { %v2975_v45 = vmul.f32 %v1255_v9, %v2567_v40  ;;  %v2981_v28 = vmul.f32 %v1256_v43, %v2567_v40 }
 0x200   :  { %4081 = vst [vmem:[#allocation66_spill] sm:$0xff] %v2963_v32  ;;  %4082 = vst [vmem:[#allocation67_spill] sm:$0xff] %v2969_v42  ;;  %v1257_v32 = vld [vmem:[%s4001_s0 + $0x220] sm:$0xff]  ;;  %v1258_v42 = vld [vmem:[%s4001_s0 + $0x228] sm:$0xff] }
 0x201   :  { %4083 = vst [vmem:[#allocation68_spill] sm:$0xff] %v2975_v45  ;;  %4084 = vst [vmem:[#allocation69_spill] sm:$0xff] %v2981_v28  ;;  %v2987_v41 = vmul.f32 %v1257_v32, %v2567_v40  ;;  %v2993_v9 = vmul.f32 %v1258_v42, %v2567_v40  ;;  %v1259_v45 = vld [vmem:[%s4001_s0 + $0x230] sm:$0xff]  ;;  %v1260_v28 = vld [vmem:[%s4001_s0 + $0x238] sm:$0xff] }
 0x202   :  { %v2999_v43 = vmul.f32 %v1259_v45, %v2567_v40  ;;  %v3005_v32 = vmul.f32 %v1260_v28, %v2567_v40  ;;  %v3019_v45 = vmul.f32 %v2567_v40, %v1946_v55  ;;  %v3027_v28 = vmul.f32 %v2567_v40, %v1966_v61 }
 0x203   :  { %4085 = vst [vmem:[#allocation70_spill] sm:$0xff] %v2987_v41  ;;  %4086 = vst [vmem:[#allocation71_spill] sm:$0xff] %v2993_v9  ;;  %v1261_v41 = vld [vmem:[%s4001_s0 + $0x240] sm:$0xff]  ;;  %v3015_v9 = vmul.f32 %v2567_v40, %v1936_v52  ;;  %v3035_v52 = vmul.f32 %v2567_v40, %v1986_v8  ;;  %v3039_v55 = vmul.f32 %v2567_v40, %v1996_v12 }
 0x204   :  { %4087 = vst [vmem:[#allocation72_spill] sm:$0xff] %v2999_v43  ;;  %v3011_v42 = vmul.f32 %v1261_v41, %v2567_v40  ;;  %v3023_v43 = vmul.f32 %v2567_v40, %v1956_v58  ;;  %v3031_v41 = vmul.f32 %v2567_v40, %v1976_v4  ;;  %v3043_v58 = vmul.f32 %v2567_v40, %v2006_v17 }
 0x205   :  { %v3047_v61 = vmul.f32 %v2567_v40, %v2016_v21  ;;  %v3051_v4 = vmul.f32 %v2567_v40, %v2026_v30  ;;  %v3055_v8 = vmul.f32 %v2567_v40, %v2036_v0  ;;  %v3059_v12 = vmul.f32 %v2567_v40, %v2046_v3 }
 0x206   :  { %v3063_v17 = vmul.f32 %v2567_v40, %v2056_v48  ;;  %v3067_v21 = vmul.f32 %v2567_v40, %v2066_v10  ;;  %v3071_v30 = vmul.f32 %v2567_v40, %v2076_v13  ;;  %v3075_v0 = vmul.f32 %v2567_v40, %v2086_v16 }
 0x207   :  { %v3079_v3 = vmul.f32 %v2567_v40, %v2096_v19  ;;  %v3083_v48 = vmul.f32 %v2567_v40, %v2106_v22  ;;  %v3087_v10 = vmul.f32 %v2567_v40, %v2116_v25 }
 0x208   :  { %4088 = vst [vmem:[#allocation73_spill] sm:$0xff] %v3067_v21  ;;  %4089 = vst [vmem:[#allocation74_spill] sm:$0xff] %v3071_v30  ;;  %v4094_v21 = vld [vmem:[#allocation2_spill] sm:$0xff]  ;;  %v4096_v30 = vld [vmem:[#allocation3_spill] sm:$0xff] }
 0x209   :  { %4090 = vst [vmem:[#allocation75_spill] sm:$0xff] %v3075_v0  ;;  %4091 = vst [vmem:[#allocation76_spill] sm:$0xff] %v3079_v3  ;;  %v3091_v13 = vmul.f32 %v2567_v40, %v4094_v21  ;;  %v3095_v16 = vmul.f32 %v2567_v40, %v4096_v30  ;;  %v4098_v0 = vld [vmem:[#allocation4_spill] sm:$0xff]  ;;  %v4100_v3 = vld [vmem:[#allocation5_spill] sm:$0xff] }
 0x20a   :  { %4092 = vst [vmem:[#allocation77_spill] sm:$0xff] %v3083_v48  ;;  %4093 = vst [vmem:[#allocation78_spill] sm:$0xff] %v3087_v10  ;;  %v3099_v19 = vmul.f32 %v2567_v40, %v4098_v0  ;;  %v3103_v22 = vmul.f32 %v2567_v40, %v4100_v3  ;;  %v4102_v48 = vld [vmem:[#allocation6_spill] sm:$0xff]  ;;  %v4104_v10 = vld [vmem:[#allocation7_spill] sm:$0xff] }
 0x20b   :  { %4095 = vst [vmem:[#allocation2_spill] sm:$0xff] %v3091_v13  ;;  %4097 = vst [vmem:[#allocation3_spill] sm:$0xff] %v3095_v16  ;;  %v3107_v25 = vmul.f32 %v2567_v40, %v4102_v48  ;;  %v3111_v21 = vmul.f32 %v2567_v40, %v4104_v10  ;;  %v4105_v13 = vld [vmem:[#allocation8_spill] sm:$0xff]  ;;  %v4106_v16 = vld [vmem:[#allocation9_spill] sm:$0xff] }
 0x20c   :  { %4099 = vst [vmem:[#allocation4_spill] sm:$0xff] %v3099_v19  ;;  %4101 = vst [vmem:[#allocation5_spill] sm:$0xff] %v3103_v22  ;;  %v3115_v30 = vmul.f32 %v2567_v40, %v4105_v13  ;;  %v3119_v0 = vmul.f32 %v2567_v40, %v4106_v16  ;;  %v4107_v19 = vld [vmem:[#allocation10_spill] sm:$0xff]  ;;  %v4108_v22 = vld [vmem:[#allocation11_spill] sm:$0xff]  ;;  %v3135_v13 = vmul.f32 %v2567_v40, %v2236_v39 }
 0x20d   :  { %4103 = vst [vmem:[#allocation6_spill] sm:$0xff] %v3107_v25  ;;  %v3123_v3 = vmul.f32 %v2567_v40, %v4107_v19  ;;  %v3127_v48 = vmul.f32 %v2567_v40, %v4108_v22  ;;  %v4109_v25 = vld [vmem:[#allocation12_spill] sm:$0xff]  ;;  %v3139_v16 = vmul.f32 %v2567_v40, %v2246_v47  ;;  %v3143_v19 = vmul.f32 %v2567_v40, %v2256_v57 }
 0x20e   :  { %v3131_v10 = vmul.f32 %v2567_v40, %v4109_v25  ;;  %v3147_v22 = vmul.f32 %v2567_v40, %v2266_v6  ;;  %v3151_v25 = vmul.f32 %v2567_v40, %v2276_v24  ;;  %v3155_v39 = vmul.f32 %v2567_v40, %v2286_v1 }
 0x20f   :  { %v3159_v47 = vmul.f32 %v2567_v40, %v2296_v44  ;;  %v3163_v57 = vmul.f32 %v2567_v40, %v2306_v54  ;;  %v3167_v6 = vmul.f32 %v2567_v40, %v2316_v5  ;;  %v3171_v24 = vmul.f32 %v2567_v40, %v2326_v26 }
 0x210   :  { %v3175_v1 = vmul.f32 %v2567_v40, %v2336_v36  ;;  %v3179_v44 = vmul.f32 %v2567_v40, %v2346_v50  ;;  %v3183_v54 = vmul.f32 %v2567_v40, %v2356_v62  ;;  %v3187_v5 = vmul.f32 %v2567_v40, %v2366_v20 }
 0x211   :  { %v3191_v26 = vmul.f32 %v2567_v40, %v2376_v38  ;;  %v3195_v36 = vmul.f32 %v2567_v40, %v2386_v53  ;;  %v3199_v50 = vmul.f32 %v2567_v40, %v2396_v14  ;;  %v3203_v62 = vmul.f32 %v2567_v40, %v2406_v2 }
 0x212   :  { %v3207_v20 = vmul.f32 %v2567_v40, %v2416_v56  ;;  %v3211_v38 = vmul.f32 %v2567_v40, %v2426_v15  ;;  %v3215_v53 = vmul.f32 %v2567_v40, %v2436_v35  ;;  %v3219_v14 = vmul.f32 %v2567_v40, %v2446_v7 }
 0x213   :  { %v3223_v2 = vmul.f32 %v2567_v40, %v2456_v63  ;;  %v3227_v56 = vmul.f32 %v2567_v40, %v2466_v29  ;;  %v927_v35 = vadd.f32 %v2577_v11, %v2615_v51  ;;  %v929_v7 = vadd.f32 %v2589_v33, %v2615_v51 }
 0x214   :  { %4110 = vst [vmem:[#allocation7_spill] sm:$0xff] %v3207_v20  ;;  %4111 = vst [vmem:[#allocation8_spill] sm:$0xff] %v3215_v53  ;;  %v4113_v20 = vld [vmem:[#allocation13_spill] sm:$0xff]  ;;  %v928_v53 = vadd.f32 %v2583_v60, %v2615_v51  ;;  %v930_v63 = vadd.f32 %v2595_v18, %v2615_v51  ;;  %v931_v29 = vadd.f32 %v2601_v46, %v2615_v51 }
 0x215   :  { %4112 = vst [vmem:[#allocation9_spill] sm:$0xff] %v3227_v56  ;;  %v3231_v15 = vmul.f32 %v2567_v40, %v4113_v20  ;;  %v932_v56 = vadd.f32 %v2607_v27, %v2615_v51  ;;  %v933_v40 = vadd.f32 %v2613_v49, %v2615_v51  ;;  %v934_v11 = vadd.f32 %v2621_v37, %v2615_v51  ;;  %v4114_v27 = vld [vmem:[#allocation14_spill] sm:$0xff]  ;;  %v4115_v37 = vld [vmem:[#allocation15_spill] sm:$0xff] }
 0x216   :  { %v935_v60 = vadd.f32 %v2627_v31, %v2615_v51  ;;  %v936_v33 = vadd.f32 %v2633_v59, %v2615_v51  ;;  %1055 = vst.msk [vmem:[%s4004_s3] sm:$0xff] %vm142_vm0, %v927_v35  ;;  %1056 = vst.msk [vmem:[%s4004_s3 + $0x8] sm:$0xff] %vm142_vm0, %v928_v53  ;;  %v937_v18 = vadd.f32 %v2639_v23, %v2615_v51  ;;  %v4116_v59 = vld [vmem:[#allocation16_spill] sm:$0xff]  ;;  %v4118_v53 = vld [vmem:[#allocation18_spill] sm:$0xff] }
 0x217   :  { %v938_v46 = vadd.f32 %v2645_v34, %v2615_v51  ;;  %v939_v49 = vadd.f32 %v4114_v27, %v2615_v51  ;;  %v940_v31 = vadd.f32 %v4115_v37, %v2615_v51  ;;  %1057 = vst.msk [vmem:[%s4004_s3 + $0x10] sm:$0xff] %vm142_vm0, %v929_v7  ;;  %1058 = vst.msk [vmem:[%s4004_s3 + $0x18] sm:$0xff] %vm142_vm0, %v930_v63  ;;  %v4117_v34 = vld [vmem:[#allocation17_spill] sm:$0xff]  ;;  %v4119_v7 = vld [vmem:[#allocation19_spill] sm:$0xff] }
 0x218   :  { %1059 = vst.msk [vmem:[%s4004_s3 + $0x20] sm:$0xff] %vm142_vm0, %v931_v29  ;;  %1060 = vst.msk [vmem:[%s4004_s3 + $0x28] sm:$0xff] %vm142_vm0, %v932_v56  ;;  %v941_v23 = vadd.f32 %v4116_v59, %v2615_v51  ;;  %v942_v20 = vadd.f32 %v4117_v34, %v2615_v51  ;;  %v943_v35 = vadd.f32 %v4118_v53, %v2615_v51  ;;  %v4120_v56 = vld [vmem:[#allocation20_spill] sm:$0xff]  ;;  %v4122_v37 = vld [vmem:[#allocation22_spill] sm:$0xff] }
 0x219   :  { %v944_v63 = vadd.f32 %v4119_v7, %v2615_v51  ;;  %1061 = vst.msk [vmem:[%s4004_s3 + $0x30] sm:$0xff] %vm142_vm0, %v933_v40  ;;  %1062 = vst.msk [vmem:[%s4004_s3 + $0x38] sm:$0xff] %vm142_vm0, %v934_v11  ;;  %v945_v29 = vadd.f32 %v4120_v56, %v2615_v51  ;;  %v4121_v40 = vld [vmem:[#allocation21_spill] sm:$0xff]  ;;  %v947_v59 = vadd.f32 %v4122_v37, %v2615_v51  ;;  %v4123_v11 = vld [vmem:[#allocation23_spill] sm:$0xff] }
 0x21a   :  { %1063 = vst.msk [vmem:[%s4004_s3 + $0x40] sm:$0xff] %vm142_vm0, %v935_v60  ;;  %1064 = vst.msk [vmem:[%s4004_s3 + $0x48] sm:$0xff] %vm142_vm0, %v936_v33  ;;  %v946_v27 = vadd.f32 %v4121_v40, %v2615_v51  ;;  %v948_v34 = vadd.f32 %v4123_v11, %v2615_v51  ;;  %v4124_v60 = vld [vmem:[#allocation24_spill] sm:$0xff]  ;;  %v4126_v7 = vld [vmem:[#allocation26_spill] sm:$0xff] }
 0x21b   :  { %1065 = vst.msk [vmem:[%s4004_s3 + $0x50] sm:$0xff] %vm142_vm0, %v937_v18  ;;  %1066 = vst.msk [vmem:[%s4004_s3 + $0x58] sm:$0xff] %vm142_vm0, %v938_v46  ;;  %v949_v33 = vadd.f32 %v4124_v60, %v2615_v51  ;;  %v4125_v18 = vld [vmem:[#allocation25_spill] sm:$0xff]  ;;  %v951_v56 = vadd.f32 %v4126_v7, %v2615_v51  ;;  %v4127_v46 = vld [vmem:[#allocation27_spill] sm:$0xff] }
 0x21c   :  { %1067 = vst.msk [vmem:[%s4004_s3 + $0x60] sm:$0xff] %vm142_vm0, %v939_v49  ;;  %1068 = vst.msk [vmem:[%s4004_s3 + $0x68] sm:$0xff] %vm142_vm0, %v940_v31  ;;  %v950_v53 = vadd.f32 %v4125_v18, %v2615_v51  ;;  %v952_v40 = vadd.f32 %v4127_v46, %v2615_v51  ;;  %v4128_v49 = vld [vmem:[#allocation28_spill] sm:$0xff]  ;;  %v4130_v11 = vld [vmem:[#allocation30_spill] sm:$0xff] }
 0x21d   :  { %1069 = vst.msk [vmem:[%s4004_s3 + $0x70] sm:$0xff] %vm142_vm0, %v941_v23  ;;  %1070 = vst.msk [vmem:[%s4004_s3 + $0x78] sm:$0xff] %vm142_vm0, %v942_v20  ;;  %v953_v31 = vadd.f32 %v4128_v49, %v2615_v51  ;;  %v4129_v23 = vld [vmem:[#allocation29_spill] sm:$0xff]  ;;  %v955_v60 = vadd.f32 %v4130_v11, %v2615_v51  ;;  %v4131_v20 = vld [vmem:[#allocation31_spill] sm:$0xff] }
 0x21e   :  { %1071 = vst.msk [vmem:[%s4004_s3 + $0x80] sm:$0xff] %vm142_vm0, %v943_v35  ;;  %1072 = vst.msk [vmem:[%s4004_s3 + $0x88] sm:$0xff] %vm142_vm0, %v944_v63  ;;  %v954_v37 = vadd.f32 %v4129_v23, %v2615_v51  ;;  %v956_v18 = vadd.f32 %v4131_v20, %v2615_v51  ;;  %v4132_v35 = vld [vmem:[#allocation32_spill] sm:$0xff]  ;;  %v4134_v46 = vld [vmem:[#allocation34_spill] sm:$0xff] }
 0x21f   :  { %1073 = vst.msk [vmem:[%s4004_s3 + $0x90] sm:$0xff] %vm142_vm0, %v945_v29  ;;  %1074 = vst.msk [vmem:[%s4004_s3 + $0x98] sm:$0xff] %vm142_vm0, %v946_v27  ;;  %v957_v63 = vadd.f32 %v4132_v35, %v2615_v51  ;;  %v4133_v29 = vld [vmem:[#allocation33_spill] sm:$0xff]  ;;  %v959_v49 = vadd.f32 %v4134_v46, %v2615_v51  ;;  %v4135_v27 = vld [vmem:[#allocation35_spill] sm:$0xff] }
 0x220   :  { %1075 = vst.msk [vmem:[%s4004_s3 + $0xa0] sm:$0xff] %vm142_vm0, %v947_v59  ;;  %1076 = vst.msk [vmem:[%s4004_s3 + $0xa8] sm:$0xff] %vm142_vm0, %v948_v34  ;;  %v958_v7 = vadd.f32 %v4133_v29, %v2615_v51  ;;  %v960_v23 = vadd.f32 %v4135_v27, %v2615_v51  ;;  %v4136_v59 = vld [vmem:[#allocation36_spill] sm:$0xff]  ;;  %v4138_v20 = vld [vmem:[#allocation38_spill] sm:$0xff] }
 0x221   :  { %1077 = vst.msk [vmem:[%s4004_s3 + $0xb0] sm:$0xff] %vm142_vm0, %v949_v33  ;;  %1078 = vst.msk [vmem:[%s4004_s3 + $0xb8] sm:$0xff] %vm142_vm0, %v950_v53  ;;  %v961_v34 = vadd.f32 %v4136_v59, %v2615_v51  ;;  %v4137_v33 = vld [vmem:[#allocation37_spill] sm:$0xff]  ;;  %v963_v35 = vadd.f32 %v4138_v20, %v2615_v51  ;;  %v4139_v53 = vld [vmem:[#allocation39_spill] sm:$0xff] }
 0x222   :  { %1079 = vst.msk [vmem:[%s4004_s3 + $0xc0] sm:$0xff] %vm142_vm0, %v951_v56  ;;  %1080 = vst.msk [vmem:[%s4004_s3 + $0xc8] sm:$0xff] %vm142_vm0, %v952_v40  ;;  %v962_v11 = vadd.f32 %v4137_v33, %v2615_v51  ;;  %v964_v29 = vadd.f32 %v4139_v53, %v2615_v51  ;;  %v4140_v56 = vld [vmem:[#allocation40_spill] sm:$0xff]  ;;  %v4142_v27 = vld [vmem:[#allocation42_spill] sm:$0xff] }
 0x223   :  { %1081 = vst.msk [vmem:[%s4004_s3 + $0xd0] sm:$0xff] %vm142_vm0, %v953_v31  ;;  %1082 = vst.msk [vmem:[%s4004_s3 + $0xd8] sm:$0xff] %vm142_vm0, %v954_v37  ;;  %v965_v40 = vadd.f32 %v4140_v56, %v2615_v51  ;;  %v4141_v31 = vld [vmem:[#allocation41_spill] sm:$0xff]  ;;  %v967_v59 = vadd.f32 %v4142_v27, %v2615_v51  ;;  %v4143_v37 = vld [vmem:[#allocation43_spill] sm:$0xff] }
 0x224   :  { %1083 = vst.msk [vmem:[%s4004_s3 + $0xe0] sm:$0xff] %vm142_vm0, %v955_v60  ;;  %1084 = vst.msk [vmem:[%s4004_s3 + $0xe8] sm:$0xff] %vm142_vm0, %v956_v18  ;;  %v966_v46 = vadd.f32 %v4141_v31, %v2615_v51  ;;  %v968_v33 = vadd.f32 %v4143_v37, %v2615_v51  ;;  %v4144_v60 = vld [vmem:[#allocation44_spill] sm:$0xff]  ;;  %v4146_v53 = vld [vmem:[#allocation46_spill] sm:$0xff] }
 0x225   :  { %1085 = vst.msk [vmem:[%s4004_s3 + $0xf0] sm:$0xff] %vm142_vm0, %v957_v63  ;;  %1086 = vst.msk [vmem:[%s4004_s3 + $0xf8] sm:$0xff] %vm142_vm0, %v958_v7  ;;  %v969_v18 = vadd.f32 %v4144_v60, %v2615_v51  ;;  %v4145_v63 = vld [vmem:[#allocation45_spill] sm:$0xff]  ;;  %v971_v56 = vadd.f32 %v4146_v53, %v2615_v51  ;;  %v4147_v7 = vld [vmem:[#allocation47_spill] sm:$0xff] }
 0x226   :  { %1087 = vst.msk [vmem:[%s4004_s3 + $0x100] sm:$0xff] %vm142_vm0, %v959_v49  ;;  %1088 = vst.msk [vmem:[%s4004_s3 + $0x108] sm:$0xff] %vm142_vm0, %v960_v23  ;;  %v970_v20 = vadd.f32 %v4145_v63, %v2615_v51  ;;  %v972_v31 = vadd.f32 %v4147_v7, %v2615_v51  ;;  %v4148_v49 = vld [vmem:[#allocation48_spill] sm:$0xff]  ;;  %v4150_v37 = vld [vmem:[#allocation50_spill] sm:$0xff] }
 0x227   :  { %1089 = vst.msk [vmem:[%s4004_s3 + $0x110] sm:$0xff] %vm142_vm0, %v961_v34  ;;  %1090 = vst.msk [vmem:[%s4004_s3 + $0x118] sm:$0xff] %vm142_vm0, %v962_v11  ;;  %v973_v23 = vadd.f32 %v4148_v49, %v2615_v51  ;;  %v4149_v34 = vld [vmem:[#allocation49_spill] sm:$0xff]  ;;  %v975_v60 = vadd.f32 %v4150_v37, %v2615_v51  ;;  %v4151_v11 = vld [vmem:[#allocation51_spill] sm:$0xff] }
 0x228   :  { %1091 = vst.msk [vmem:[%s4004_s3 + $0x120] sm:$0xff] %vm142_vm0, %v963_v35  ;;  %1092 = vst.msk [vmem:[%s4004_s3 + $0x128] sm:$0xff] %vm142_vm0, %v964_v29  ;;  %v974_v27 = vadd.f32 %v4149_v34, %v2615_v51  ;;  %v976_v63 = vadd.f32 %v4151_v11, %v2615_v51  ;;  %v4152_v35 = vld [vmem:[#allocation52_spill] sm:$0xff]  ;;  %v4154_v7 = vld [vmem:[#allocation54_spill] sm:$0xff] }
 0x229   :  { %1093 = vst.msk [vmem:[%s4004_s3 + $0x130] sm:$0xff] %vm142_vm0, %v965_v40  ;;  %1094 = vst.msk [vmem:[%s4004_s3 + $0x138] sm:$0xff] %vm142_vm0, %v966_v46  ;;  %v977_v29 = vadd.f32 %v4152_v35, %v2615_v51  ;;  %v4153_v40 = vld [vmem:[#allocation53_spill] sm:$0xff]  ;;  %v979_v49 = vadd.f32 %v4154_v7, %v2615_v51  ;;  %v4155_v46 = vld [vmem:[#allocation55_spill] sm:$0xff] }
 0x22a   :  { %1095 = vst.msk [vmem:[%s4004_s3 + $0x140] sm:$0xff] %vm142_vm0, %v967_v59  ;;  %1096 = vst.msk [vmem:[%s4004_s3 + $0x148] sm:$0xff] %vm142_vm0, %v968_v33  ;;  %v978_v53 = vadd.f32 %v4153_v40, %v2615_v51  ;;  %v980_v34 = vadd.f32 %v4155_v46, %v2615_v51  ;;  %v4156_v59 = vld [vmem:[#allocation56_spill] sm:$0xff]  ;;  %v4158_v11 = vld [vmem:[#allocation58_spill] sm:$0xff] }
 0x22b   :  { %1097 = vst.msk [vmem:[%s4004_s3 + $0x150] sm:$0xff] %vm142_vm0, %v969_v18  ;;  %1098 = vst.msk [vmem:[%s4004_s3 + $0x158] sm:$0xff] %vm142_vm0, %v970_v20  ;;  %v981_v33 = vadd.f32 %v4156_v59, %v2615_v51  ;;  %v4157_v18 = vld [vmem:[#allocation57_spill] sm:$0xff]  ;;  %v983_v35 = vadd.f32 %v4158_v11, %v2615_v51  ;;  %v4159_v20 = vld [vmem:[#allocation59_spill] sm:$0xff] }
 0x22c   :  { %1099 = vst.msk [vmem:[%s4004_s3 + $0x160] sm:$0xff] %vm142_vm0, %v971_v56  ;;  %1100 = vst.msk [vmem:[%s4004_s3 + $0x168] sm:$0xff] %vm142_vm0, %v972_v31  ;;  %v982_v37 = vadd.f32 %v4157_v18, %v2615_v51  ;;  %v984_v40 = vadd.f32 %v4159_v20, %v2615_v51  ;;  %v4160_v56 = vld [vmem:[#allocation60_spill] sm:$0xff]  ;;  %v4162_v46 = vld [vmem:[#allocation62_spill] sm:$0xff] }
 0x22d   :  { %1101 = vst.msk [vmem:[%s4004_s3 + $0x170] sm:$0xff] %vm142_vm0, %v973_v23  ;;  %1102 = vst.msk [vmem:[%s4004_s3 + $0x178] sm:$0xff] %vm142_vm0, %v974_v27  ;;  %v985_v31 = vadd.f32 %v4160_v56, %v2615_v51  ;;  %v4161_v23 = vld [vmem:[#allocation61_spill] sm:$0xff]  ;;  %v987_v59 = vadd.f32 %v4162_v46, %v2615_v51  ;;  %v4163_v27 = vld [vmem:[#allocation63_spill] sm:$0xff] }
 0x22e   :  { %1103 = vst.msk [vmem:[%s4004_s3 + $0x180] sm:$0xff] %vm142_vm0, %v975_v60  ;;  %1104 = vst.msk [vmem:[%s4004_s3 + $0x188] sm:$0xff] %vm142_vm0, %v976_v63  ;;  %v986_v7 = vadd.f32 %v4161_v23, %v2615_v51  ;;  %v988_v18 = vadd.f32 %v4163_v27, %v2615_v51  ;;  %v4164_v60 = vld [vmem:[#allocation64_spill] sm:$0xff]  ;;  %v4166_v20 = vld [vmem:[#allocation66_spill] sm:$0xff] }
 0x22f   :  { %1105 = vst.msk [vmem:[%s4004_s3 + $0x190] sm:$0xff] %vm142_vm0, %v977_v29  ;;  %1106 = vst.msk [vmem:[%s4004_s3 + $0x198] sm:$0xff] %vm142_vm0, %v978_v53  ;;  %v989_v63 = vadd.f32 %v4164_v60, %v2615_v51  ;;  %v4165_v29 = vld [vmem:[#allocation65_spill] sm:$0xff]  ;;  %v991_v56 = vadd.f32 %v4166_v20, %v2615_v51  ;;  %v4167_v53 = vld [vmem:[#allocation67_spill] sm:$0xff]  ;;  %v999_v20 = vadd.f32 %v3011_v42, %v2615_v51 }
 0x230   :  { %1107 = vst.msk [vmem:[%s4004_s3 + $0x1a0] sm:$0xff] %vm142_vm0, %v979_v49  ;;  %1108 = vst.msk [vmem:[%s4004_s3 + $0x1a8] sm:$0xff] %vm142_vm0, %v980_v34  ;;  %v990_v11 = vadd.f32 %v4165_v29, %v2615_v51  ;;  %v992_v23 = vadd.f32 %v4167_v53, %v2615_v51  ;;  %v4168_v49 = vld [vmem:[#allocation68_spill] sm:$0xff]  ;;  %v4170_v27 = vld [vmem:[#allocation70_spill] sm:$0xff]  ;;  %v1003_v42 = vadd.f32 %v3027_v28, %v2615_v51 }
 0x231   :  { %1109 = vst.msk [vmem:[%s4004_s3 + $0x1b0] sm:$0xff] %vm142_vm0, %v981_v33  ;;  %1110 = vst.msk [vmem:[%s4004_s3 + $0x1b8] sm:$0xff] %vm142_vm0, %v982_v37  ;;  %v993_v34 = vadd.f32 %v4168_v49, %v2615_v51  ;;  %v4169_v33 = vld [vmem:[#allocation69_spill] sm:$0xff]  ;;  %v995_v60 = vadd.f32 %v4170_v27, %v2615_v51  ;;  %v4171_v37 = vld [vmem:[#allocation71_spill] sm:$0xff]  ;;  %v1007_v28 = vadd.f32 %v3043_v58, %v2615_v51 }
 0x232   :  { %1111 = vst.msk [vmem:[%s4004_s3 + $0x1c0] sm:$0xff] %vm142_vm0, %v983_v35  ;;  %1112 = vst.msk [vmem:[%s4004_s3 + $0x1c8] sm:$0xff] %vm142_vm0, %v984_v40  ;;  %v994_v46 = vadd.f32 %v4169_v33, %v2615_v51  ;;  %v996_v29 = vadd.f32 %v4171_v37, %v2615_v51  ;;  %v4172_v35 = vld [vmem:[#allocation72_spill] sm:$0xff]  ;;  %v1011_v58 = vadd.f32 %v3059_v12, %v2615_v51  ;;  %v4174_v12 = vld [vmem:[#allocation74_spill] sm:$0xff] }
 0x233   :  { %1113 = vst.msk [vmem:[%s4004_s3 + $0x1d0] sm:$0xff] %vm142_vm0, %v985_v31  ;;  %1114 = vst.msk [vmem:[%s4004_s3 + $0x1d8] sm:$0xff] %vm142_vm0, %v986_v7  ;;  %v997_v40 = vadd.f32 %v4172_v35, %v2615_v51  ;;  %v998_v31 = vadd.f32 %v3005_v32, %v2615_v51  ;;  %v1000_v7 = vadd.f32 %v3015_v9, %v2615_v51  ;;  %v4177_v53 = vld [vmem:[#allocation77_spill] sm:$0xff]  ;;  %v4178_v49 = vld [vmem:[#allocation78_spill] sm:$0xff] }
 0x234   :  { %1115 = vst.msk [vmem:[%s4004_s3 + $0x1e0] sm:$0xff] %vm142_vm0, %v987_v59  ;;  %1116 = vst.msk [vmem:[%s4004_s3 + $0x1e8] sm:$0xff] %vm142_vm0, %v988_v18  ;;  %v1001_v9 = vadd.f32 %v3019_v45, %v2615_v51  ;;  %v1002_v32 = vadd.f32 %v3023_v43, %v2615_v51  ;;  %v1004_v59 = vadd.f32 %v3031_v41, %v2615_v51  ;;  %v4175_v18 = vld [vmem:[#allocation75_spill] sm:$0xff]  ;;  %v4179_v33 = vld [vmem:[#allocation2_spill] sm:$0xff] }
 0x235   :  { %1117 = vst.msk [vmem:[%s4004_s3 + $0x1f0] sm:$0xff] %vm142_vm0, %v989_v63  ;;  %1118 = vst.msk [vmem:[%s4004_s3 + $0x1f8] sm:$0xff] %vm142_vm0, %v990_v11  ;;  %v1005_v43 = vadd.f32 %v3035_v52, %v2615_v51  ;;  %v1006_v45 = vadd.f32 %v3039_v55, %v2615_v51  ;;  %v1008_v41 = vadd.f32 %v3047_v61, %v2615_v51  ;;  %v4176_v11 = vld [vmem:[#allocation76_spill] sm:$0xff]  ;;  %v4180_v27 = vld [vmem:[#allocation3_spill] sm:$0xff] }
 0x236   :  { %1119 = vst.msk [vmem:[%s4004_s3 + $0x200] sm:$0xff] %vm142_vm0, %v991_v56  ;;  %1120 = vst.msk [vmem:[%s4004_s3 + $0x208] sm:$0xff] %vm142_vm0, %v992_v23  ;;  %v1009_v52 = vadd.f32 %v3051_v4, %v2615_v51  ;;  %v1010_v55 = vadd.f32 %v3055_v8, %v2615_v51  ;;  %v1012_v61 = vadd.f32 %v3063_v17, %v2615_v51  ;;  %v4173_v4 = vld [vmem:[#allocation73_spill] sm:$0xff]  ;;  %v4181_v37 = vld [vmem:[#allocation4_spill] sm:$0xff] }
 0x237   :  { %1121 = vst.msk [vmem:[%s4004_s3 + $0x210] sm:$0xff] %vm142_vm0, %v993_v34  ;;  %1122 = vst.msk [vmem:[%s4004_s3 + $0x218] sm:$0xff] %vm142_vm0, %v994_v46  ;;  %v1013_v8 = vadd.f32 %v4173_v4, %v2615_v51  ;;  %v1014_v17 = vadd.f32 %v4174_v12, %v2615_v51  ;;  %v1015_v63 = vadd.f32 %v4175_v18, %v2615_v51  ;;  %v4182_v35 = vld [vmem:[#allocation5_spill] sm:$0xff] }
 0x238   :  { %1123 = vst.msk [vmem:[%s4004_s3 + $0x220] sm:$0xff] %vm142_vm0, %v995_v60  ;;  %1124 = vst.msk [vmem:[%s4004_s3 + $0x228] sm:$0xff] %vm142_vm0, %v996_v29  ;;  %v1016_v56 = vadd.f32 %v4176_v11, %v2615_v51  ;;  %v1017_v23 = vadd.f32 %v4177_v53, %v2615_v51  ;;  %v1018_v34 = vadd.f32 %v4178_v49, %v2615_v51 }
 0x239   :  { %1125 = vst.msk [vmem:[%s4004_s3 + $0x230] sm:$0xff] %vm142_vm0, %v997_v40  ;;  %1126 = vst.msk [vmem:[%s4004_s3 + $0x238] sm:$0xff] %vm142_vm0, %v998_v31  ;;  %v1019_v46 = vadd.f32 %v4179_v33, %v2615_v51  ;;  %v1020_v60 = vadd.f32 %v4180_v27, %v2615_v51  ;;  %v1021_v29 = vadd.f32 %v4181_v37, %v2615_v51  ;;  %v4183_v31 = vld [vmem:[#allocation6_spill] sm:$0xff] }
 0x23a   :  { %1127 = vst.msk [vmem:[%s4004_s3 + $0x240] sm:$0xff] %vm142_vm0, %v999_v20  ;;  %1128 = vst.msk [vmem:[%s4004_s3 + $0x248] sm:$0xff] %vm142_vm0, %v1000_v7  ;;  %v1022_v40 = vadd.f32 %v4182_v35, %v2615_v51  ;;  %v1023_v20 = vadd.f32 %v4183_v31, %v2615_v51  ;;  %v1024_v7 = vadd.f32 %v3111_v21, %v2615_v51 }
 0x23b   :  { %1129 = vst.msk [vmem:[%s4004_s3 + $0x250] sm:$0xff] %vm142_vm0, %v1001_v9  ;;  %1130 = vst.msk [vmem:[%s4004_s3 + $0x258] sm:$0xff] %vm142_vm0, %v1002_v32  ;;  %v1025_v21 = vadd.f32 %v3115_v30, %v2615_v51  ;;  %v1026_v9 = vadd.f32 %v3119_v0, %v2615_v51  ;;  %v1027_v32 = vadd.f32 %v3123_v3, %v2615_v51 }
 0x23c   :  { %1131 = vst.msk [vmem:[%s4004_s3 + $0x260] sm:$0xff] %vm142_vm0, %v1003_v42  ;;  %1132 = vst.msk [vmem:[%s4004_s3 + $0x268] sm:$0xff] %vm142_vm0, %v1004_v59  ;;  %v1028_v42 = vadd.f32 %v3127_v48, %v2615_v51  ;;  %v1029_v30 = vadd.f32 %v3131_v10, %v2615_v51  ;;  %v1030_v0 = vadd.f32 %v3135_v13, %v2615_v51 }
 0x23d   :  { %1133 = vst.msk [vmem:[%s4004_s3 + $0x270] sm:$0xff] %vm142_vm0, %v1005_v43  ;;  %1134 = vst.msk [vmem:[%s4004_s3 + $0x278] sm:$0xff] %vm142_vm0, %v1006_v45  ;;  %v1031_v3 = vadd.f32 %v3139_v16, %v2615_v51  ;;  %v1032_v48 = vadd.f32 %v3143_v19, %v2615_v51  ;;  %v1033_v10 = vadd.f32 %v3147_v22, %v2615_v51 }
 0x23e   :  { %1135 = vst.msk [vmem:[%s4004_s3 + $0x280] sm:$0xff] %vm142_vm0, %v1007_v28  ;;  %1136 = vst.msk [vmem:[%s4004_s3 + $0x288] sm:$0xff] %vm142_vm0, %v1008_v41  ;;  %v1034_v13 = vadd.f32 %v3151_v25, %v2615_v51  ;;  %v1035_v16 = vadd.f32 %v3155_v39, %v2615_v51  ;;  %v1036_v19 = vadd.f32 %v3159_v47, %v2615_v51 }
 0x23f   :  { %1137 = vst.msk [vmem:[%s4004_s3 + $0x290] sm:$0xff] %vm142_vm0, %v1009_v52  ;;  %1138 = vst.msk [vmem:[%s4004_s3 + $0x298] sm:$0xff] %vm142_vm0, %v1010_v55  ;;  %v1037_v22 = vadd.f32 %v3163_v57, %v2615_v51  ;;  %v1038_v25 = vadd.f32 %v3167_v6, %v2615_v51  ;;  %v1039_v39 = vadd.f32 %v3171_v24, %v2615_v51 }
 0x240   :  { %1139 = vst.msk [vmem:[%s4004_s3 + $0x2a0] sm:$0xff] %vm142_vm0, %v1011_v58  ;;  %1140 = vst.msk [vmem:[%s4004_s3 + $0x2a8] sm:$0xff] %vm142_vm0, %v1012_v61  ;;  %v1040_v47 = vadd.f32 %v3175_v1, %v2615_v51  ;;  %v1041_v57 = vadd.f32 %v3179_v44, %v2615_v51  ;;  %v1042_v6 = vadd.f32 %v3183_v54, %v2615_v51 }
 0x241   :  { %1141 = vst.msk [vmem:[%s4004_s3 + $0x2b0] sm:$0xff] %vm142_vm0, %v1013_v8  ;;  %1142 = vst.msk [vmem:[%s4004_s3 + $0x2b8] sm:$0xff] %vm142_vm0, %v1014_v17  ;;  %v1043_v24 = vadd.f32 %v3187_v5, %v2615_v51  ;;  %v1044_v1 = vadd.f32 %v3191_v26, %v2615_v51  ;;  %v1045_v44 = vadd.f32 %v3195_v36, %v2615_v51  ;;  %v4184_v26 = vld [vmem:[#allocation7_spill] sm:$0xff] }
 0x242   :  { %1143 = vst.msk [vmem:[%s4004_s3 + $0x2c0] sm:$0xff] %vm142_vm0, %v1015_v63  ;;  %1144 = vst.msk [vmem:[%s4004_s3 + $0x2c8] sm:$0xff] %vm142_vm0, %v1016_v56  ;;  %v1046_v54 = vadd.f32 %v3199_v50, %v2615_v51  ;;  %v1047_v5 = vadd.f32 %v3203_v62, %v2615_v51  ;;  %v1048_v59 = vadd.f32 %v4184_v26, %v2615_v51  ;;  %v4185_v50 = vld [vmem:[#allocation8_spill] sm:$0xff] }
 0x243   :  { %1145 = vst.msk [vmem:[%s4004_s3 + $0x2d0] sm:$0xff] %vm142_vm0, %v1017_v23  ;;  %1146 = vst.msk [vmem:[%s4004_s3 + $0x2d8] sm:$0xff] %vm142_vm0, %v1018_v34  ;;  %v1049_v36 = vadd.f32 %v3211_v38, %v2615_v51  ;;  %v1050_v62 = vadd.f32 %v4185_v50, %v2615_v51  ;;  %v1051_v43 = vadd.f32 %v3219_v14, %v2615_v51  ;;  %v4186_v38 = vld [vmem:[#allocation9_spill] sm:$0xff] }
 0x244   :  { %1147 = vst.msk [vmem:[%s4004_s3 + $0x2e0] sm:$0xff] %vm142_vm0, %v1019_v46  ;;  %1148 = vst.msk [vmem:[%s4004_s3 + $0x2e8] sm:$0xff] %vm142_vm0, %v1020_v60  ;;  %v1052_v45 = vadd.f32 %v3223_v2, %v2615_v51  ;;  %v1053_v14 = vadd.f32 %v4186_v38, %v2615_v51  ;;  %v1054_v2 = vadd.f32 %v3231_v15, %v2615_v51 }
 0x245   :  { %1149 = vst.msk [vmem:[%s4004_s3 + $0x2f0] sm:$0xff] %vm142_vm0, %v1021_v29  ;;  %1150 = vst.msk [vmem:[%s4004_s3 + $0x2f8] sm:$0xff] %vm142_vm0, %v1022_v40 }
 0x246   :  { %1151 = vst.msk [vmem:[%s4004_s3 + $0x300] sm:$0xff] %vm142_vm0, %v1023_v20  ;;  %1152 = vst.msk [vmem:[%s4004_s3 + $0x308] sm:$0xff] %vm142_vm0, %v1024_v7 }
 0x247   :  { %1153 = vst.msk [vmem:[%s4004_s3 + $0x310] sm:$0xff] %vm142_vm0, %v1025_v21  ;;  %1154 = vst.msk [vmem:[%s4004_s3 + $0x318] sm:$0xff] %vm142_vm0, %v1026_v9 }
 0x248   :  { %1155 = vst.msk [vmem:[%s4004_s3 + $0x320] sm:$0xff] %vm142_vm0, %v1027_v32  ;;  %1156 = vst.msk [vmem:[%s4004_s3 + $0x328] sm:$0xff] %vm142_vm0, %v1028_v42 }
 0x249   :  { %1157 = vst.msk [vmem:[%s4004_s3 + $0x330] sm:$0xff] %vm142_vm0, %v1029_v30  ;;  %1158 = vst.msk [vmem:[%s4004_s3 + $0x338] sm:$0xff] %vm142_vm0, %v1030_v0 }
 0x24a   :  { %1159 = vst.msk [vmem:[%s4004_s3 + $0x340] sm:$0xff] %vm142_vm0, %v1031_v3  ;;  %1160 = vst.msk [vmem:[%s4004_s3 + $0x348] sm:$0xff] %vm142_vm0, %v1032_v48 }
 0x24b   :  { %1161 = vst.msk [vmem:[%s4004_s3 + $0x350] sm:$0xff] %vm142_vm0, %v1033_v10  ;;  %1162 = vst.msk [vmem:[%s4004_s3 + $0x358] sm:$0xff] %vm142_vm0, %v1034_v13 }
 0x24c   :  { %1163 = vst.msk [vmem:[%s4004_s3 + $0x360] sm:$0xff] %vm142_vm0, %v1035_v16  ;;  %1164 = vst.msk [vmem:[%s4004_s3 + $0x368] sm:$0xff] %vm142_vm0, %v1036_v19 }
 0x24d   :  { %1165 = vst.msk [vmem:[%s4004_s3 + $0x370] sm:$0xff] %vm142_vm0, %v1037_v22  ;;  %1166 = vst.msk [vmem:[%s4004_s3 + $0x378] sm:$0xff] %vm142_vm0, %v1038_v25 }
 0x24e   :  { %1167 = vst.msk [vmem:[%s4004_s3 + $0x380] sm:$0xff] %vm142_vm0, %v1039_v39  ;;  %1168 = vst.msk [vmem:[%s4004_s3 + $0x388] sm:$0xff] %vm142_vm0, %v1040_v47 }
 0x24f   :  { %1169 = vst.msk [vmem:[%s4004_s3 + $0x390] sm:$0xff] %vm142_vm0, %v1041_v57  ;;  %1170 = vst.msk [vmem:[%s4004_s3 + $0x398] sm:$0xff] %vm142_vm0, %v1042_v6 }
 0x250   :  { %1171 = vst.msk [vmem:[%s4004_s3 + $0x3a0] sm:$0xff] %vm142_vm0, %v1043_v24  ;;  %1172 = vst.msk [vmem:[%s4004_s3 + $0x3a8] sm:$0xff] %vm142_vm0, %v1044_v1 }
 0x251   :  { %1173 = vst.msk [vmem:[%s4004_s3 + $0x3b0] sm:$0xff] %vm142_vm0, %v1045_v44  ;;  %1174 = vst.msk [vmem:[%s4004_s3 + $0x3b8] sm:$0xff] %vm142_vm0, %v1046_v54 }
 0x252   :  { %1175 = vst.msk [vmem:[%s4004_s3 + $0x3c0] sm:$0xff] %vm142_vm0, %v1047_v5  ;;  %1176 = vst.msk [vmem:[%s4004_s3 + $0x3c8] sm:$0xff] %vm142_vm0, %v1048_v59 }
 0x253   :  { %1177 = vst.msk [vmem:[%s4004_s3 + $0x3d0] sm:$0xff] %vm142_vm0, %v1049_v36  ;;  %1178 = vst.msk [vmem:[%s4004_s3 + $0x3d8] sm:$0xff] %vm142_vm0, %v1050_v62 }
 0x254   :  { %1179 = vst.msk [vmem:[%s4004_s3 + $0x3e0] sm:$0xff] %vm142_vm0, %v1051_v43  ;;  %1180 = vst.msk [vmem:[%s4004_s3 + $0x3e8] sm:$0xff] %vm142_vm0, %v1052_v45 }
 0x255   :  { %1181 = vst.msk [vmem:[%s4004_s3 + $0x3f0] sm:$0xff] %vm142_vm0, %v1053_v14  ;;  %1182 = vst.msk [vmem:[%s4004_s3 + $0x3f8] sm:$0xff] %vm142_vm0, %v1054_v2 }

</bundles_post_ra>
